<compile_context>
chip_gen: v6e
topology: v6e:2x2x1
jax: 0.10.0
libtpu: 0.0.40
codegen_flags: <defaults>
</compile_context>

<pallas_src>
import jax
import jax.numpy as jnp
from jax.experimental import pallas as pl
from jax.experimental.pallas import tpu as pltpu

_EPS = 1e-5
_PAD_COLS = 256            # per-depth (hp, wp, c1) slab, 7*7*4 = 196 padded to 256


# --------------------------------------------------------------------------
# The single fused Pallas kernel
# --------------------------------------------------------------------------
def _fused_kernel(p1_ref, w1_ref, g1_ref, b1_ref, t1_ref, t1t_ref,
                  w2_ref, g2_ref, b2_ref, t2_ref, t2t_ref,
                  w3_ref, g3_ref, b3_ref,
                  wfc_ref, bfc_ref,
                  o_ref):
    f32 = jnp.float32
    n = o_ref.shape[0]                      # batch size (static)

    # ----- conv1 + BN1 + ReLU -------------------------------------------------
    # p1: [5N, 1600] rows=(d, n), cols=(h, w, kd, kh, kw)
    # w1: [1600, 256] structured so output cols = padded (hp, wp, c1); the
    #     padding ring / tail columns are exactly zero.
    a1 = jnp.dot(p1_ref[...], w1_ref[...], preferred_element_type=f32)   # [5N, 256]

    cnt1 = 125.0 * n                                       # 5*5*5 positions per sample
    csum1 = jnp.sum(a1, axis=0, keepdims=True)             # [1, 256]
    csq1 = jnp.sum(a1 * a1, axis=0, keepdims=True)         # [1, 256]
    chsum1 = jnp.dot(csum1, t1t_ref[...], preferred_element_type=f32)    # [1, 4]
    chsq1 = jnp.dot(csq1, t1t_ref[...], preferred_element_type=f32)      # [1, 4]
    mean1 = chsum1 / cnt1
    var1 = chsq1 / cnt1 - mean1 * mean1                    # one-pass biased variance
    scale1 = g1_ref[...] * jax.lax.rsqrt(var1 + _EPS)      # [1, 4]
    shift1 = b1_ref[...] - mean1 * scale1
    # broadcast back to the padded layout; T1 is zero on ring/pad columns, so
    # the zero padding stays exactly zero after BN+ReLU.
    scale1w = jnp.dot(scale1, t1_ref[...], preferred_element_type=f32)   # [1, 256]
    shift1w = jnp.dot(shift1, t1_ref[...], preferred_element_type=f32)
    a1 = jnp.maximum(a1 * scale1w + shift1w, 0.0)          # [5N, 256]

    # ----- conv2 ----------------------------------------------------------------
    # Lane-concatenate the 5 depth slabs (256-aligned -> pure vreg placement)
    # and do the whole conv as one matmul against the structured weight.
    cat = jnp.concatenate([a1[d * n:(d + 1) * n, :] for d in range(5)], axis=1)  # [N, 1280]
    z2 = jnp.dot(cat, w2_ref[...], preferred_element_type=f32)                   # [N, 64]

    cnt2 = 8.0 * n                                         # 2*2*2 positions per sample
    csum2 = jnp.sum(z2, axis=0, keepdims=True)             # [1, 64]
    csq2 = jnp.sum(z2 * z2, axis=0, keepdims=True)
    chsum2 = jnp.dot(csum2, t2t_ref[...], preferred_element_type=f32)    # [1, 8]
    chsq2 = jnp.dot(csq2, t2t_ref[...], preferred_element_type=f32)
    mean2 = chsum2 / cnt2
    var2 = chsq2 / cnt2 - mean2 * mean2
    scale2 = g2_ref[...] * jax.lax.rsqrt(var2 + _EPS)      # [1, 8]
    shift2 = b2_ref[...] - mean2 * scale2
    scale2w = jnp.dot(scale2, t2_ref[...], preferred_element_type=f32)   # [1, 64]
    shift2w = jnp.dot(shift2, t2_ref[...], preferred_element_type=f32)
    a2 = jnp.maximum(z2 * scale2w + shift2w, 0.0)          # [N, 64]

    # ----- conv3 + BN3 + ReLU ---------------------------------------------------
    z3 = jnp.dot(a2, w3_ref[...], preferred_element_type=f32)            # [N, 16]
    mean3 = jnp.sum(z3, axis=0, keepdims=True) / float(n)
    var3 = jnp.sum(z3 * z3, axis=0, keepdims=True) / float(n) - mean3 * mean3
    scale3 = g3_ref[...] * jax.lax.rsqrt(var3 + _EPS)
    shift3 = b3_ref[...] - mean3 * scale3
    a3 = jnp.maximum(z3 * scale3 + shift3, 0.0)            # [N, 16]

    # ----- fc -------------------------------------------------------------------
    o_ref[...] = jnp.dot(a3, wfc_ref[...], preferred_element_type=f32) + bfc_ref[...]


def _full_spec(shape):
    return pl.BlockSpec(shape, lambda i: (0,) * len(shape))


def _fused_pallas(*args):
    n = args[0].shape[0] // 5
    return pl.pallas_call(
        _fused_kernel,
        out_shape=jax.ShapeDtypeStruct((n, 2), jnp.float32),
        grid=(1,),
        in_specs=[_full_spec(a.shape) for a in args],
        out_specs=_full_spec((n, 2)),
        compiler_params=pltpu.CompilerParams(dimension_semantics=("arbitrary",)),
    )(*args)


# --------------------------------------------------------------------------
# Plain-JAX wrapper glue: conv1 patches + structured weight / mask matrices
# --------------------------------------------------------------------------
def _conv1_patches(x):
    # x: [N, 1, 16, 16, 16] -> [5N, 1600], rows=(d, n), cols=(h, w, kd, kh, kw)
    n = x.shape[0]
    xp = jnp.pad(x[:, 0], ((0, 0), (1, 1), (1, 1), (1, 1)))   # [N, 18, 18, 18]

    def expand(t, axis):
        # split a padded size-18 axis into (out=5, tap=4): out[o, k] = t[3*o + k]
        main = jax.lax.slice_in_dim(t, 0, 15, axis=axis)
        extra = jax.lax.slice_in_dim(t, 3, 18, axis=axis)
        shp = list(main.shape)
        shp[axis:axis + 1] = [5, 3]
        main = main.reshape(shp)
        extra = extra.reshape(shp)
        extra = jax.lax.slice_in_dim(extra, 0, 1, axis=axis + 1)
        return jnp.concatenate([main, extra], axis=axis + 1)

    t = expand(xp, 3)     # (n, D, H, w, kw)
    t = expand(t, 2)      # (n, D, h, kh, w, kw)
    t = expand(t, 1)      # (n, d, kd, h, kh, w, kw)
    t = jnp.transpose(t, (1, 0, 3, 5, 2, 4, 6))   # (d, n, h, w, kd, kh, kw)
    return t.reshape(5 * n, 1600)


def _prepare_inputs(params, x):
    f32 = jnp.float32
    p1 = _conv1_patches(x.astype(f32))            # [5N, 1600]

    # --- conv1 structured weight: rows (h, w, taps), cols padded (hp, wp, c1) ---
    w1mat = params["conv1_w"].reshape(4, 64).T.astype(f32)          # [64, 4]
    p57 = jnp.zeros((5, 7), f32).at[jnp.arange(5), jnp.arange(5) + 1].set(1.0)
    pp = jnp.kron(p57, p57)                                         # [25, 49]
    w1 = jnp.kron(pp, w1mat)                                        # [1600, 196]
    w1 = jnp.pad(w1, ((0, 0), (0, _PAD_COLS - 196)))                # [1600, 256]

    # channel <-> padded-column tile/mask matrix (zero on the padding ring)
    mask7 = jnp.zeros((1, 7), f32).at[0, 1:6].set(1.0)
    m49 = jnp.kron(mask7, mask7)                                    # [1, 49]
    t1 = jnp.kron(m49, jnp.eye(4, dtype=f32))                       # [4, 196]
    t1 = jnp.pad(t1, ((0, 0), (0, _PAD_COLS - 196)))                # [4, 256]
    t1t = t1.T                                                      # [256, 4]

    # --- conv2 structured weight: rows (d, hp, wp, c1), cols (do, ho, wo, c2) ---
    kd_hot = (jnp.arange(4)[None, None, :] ==
              (jnp.arange(5)[:, None, None] + 1 - 3 * jnp.arange(2)[None, :, None])
              ).astype(f32)                                         # [5, 2, 4]
    kh_hot = (jnp.arange(4)[None, None, :] ==
              (jnp.arange(7)[:, None, None] - 3 * jnp.arange(2)[None, :, None])
              ).astype(f32)                                         # [7, 2, 4]
    w2t = jnp.transpose(params["conv2_w"], (2, 3, 4, 1, 0)).astype(f32)   # [kd,kh,kw,c1,c2]
    w2 = jnp.einsum("dDa,hHb,wWc,abcef->dhweDHWf", kd_hot, kh_hot, kh_hot, w2t)
    w2 = w2.reshape(5, 196, 64)
    w2 = jnp.pad(w2, ((0, 0), (0, _PAD_COLS - 196), (0, 0))).reshape(5 * _PAD_COLS, 64)

    t2 = jnp.kron(jnp.ones((1, 8), f32), jnp.eye(8, dtype=f32))     # [8, 64]
    t2t = t2.T                                                      # [64, 8]

    # --- conv3: only the central 2x2x2 taps ever touch real data ---
    w3c = params["conv3_w"][:, :, 1:3, 1:3, 1:3].astype(f32)        # [16, 8, 2, 2, 2]
    w3 = jnp.transpose(w3c, (2, 3, 4, 1, 0)).reshape(64, 16)        # rows (do,ho,wo,c2)

    wfc = params["fc_w"].T.astype(f32)                              # [16, 2]
    bfc = params["fc_b"].reshape(1, 2).astype(f32)

    # NOTE: conv biases are intentionally NOT used: a per-channel constant added
    # before training-mode BatchNorm is exactly cancelled by the mean subtraction.
    return (p1, w1,
            params["bn1_g"].reshape(1, 4).astype(f32), params["bn1_b"].reshape(1, 4).astype(f32),
            t1, t1t,
            w2,
            params["bn2_g"].reshape(1, 8).astype(f32), params["bn2_b"].reshape(1, 8).astype(f32),
            t2, t2t,
            w3,
            params["bn3_g"].reshape(1, 16).astype(f32), params["bn3_b"].reshape(1, 16).astype(f32),
            wfc, bfc)


@jax.jit
def simple_model_forward(params, x):
    # x: [N, 1, 16, 16, 16] -> logits [N, 2]
    return _fused_pallas(*_prepare_inputs(params, x))


# --------------------------------------------------------------------------
# Pure-JAX reference (training-mode BatchNorm, same as PyTorch default mode)
# --------------------------------------------------------------------------
@jax.jit
def _reference_forward(params, x):
    hi = jax.lax.Precision.HIGHEST

    def conv(h, w, b):
        out = jax.lax.conv_general_dilated(
            h, w, window_strides=(3, 3, 3), padding=[(1, 1)] * 3,
            dimension_numbers=("NCDHW", "OIDHW", "NCDHW"), precision=hi)
        return out + b.reshape(1, -1, 1, 1, 1)

    def bn_relu(h, g, b):
        mean = jnp.mean(h, axis=(0, 2, 3, 4), keepdims=True)
        var = jnp.mean((h - mean) ** 2, axis=(0, 2, 3, 4), keepdims=True)
        y = (h - mean) * jax.lax.rsqrt(var + _EPS)
        y = y * g.reshape(1, -1, 1, 1, 1) + b.reshape(1, -1, 1, 1, 1)
        return jnp.maximum(y, 0.0)

    h = bn_relu(conv(x, params["conv1_w"], params["conv1_b"]), params["bn1_g"], params["bn1_b"])
    h = bn_relu(conv(h, params["conv2_w"], params["conv2_b"]), params["bn2_g"], params["bn2_b"])
    h = bn_relu(conv(h, params["conv3_w"], params["conv3_b"]), params["bn3_g"], params["bn3_b"])
    h = h.reshape(h.shape[0], -1)
    return jnp.dot(h, params["fc_w"].T, precision=hi) + params["fc_b"]


# --------------------------------------------------------------------------
# Parameter init (deterministic, PyTorch-default-style uniform bounds)
# --------------------------------------------------------------------------
def init_params(key):
    def conv_init(key, cout, cin, k):
        fan_in = cin * k * k * k
        bound = 1.0 / jnp.sqrt(fan_in)
        kw, kb = jax.random.split(key)
        w = jax.random.uniform(kw, (cout, cin, k, k, k), jnp.float32, -bound, bound)
        b = jax.random.uniform(kb, (cout,), jnp.float32, -bound, bound)
        return w, b

    def linear_init(key, out_f, in_f):
        bound = 1.0 / jnp.sqrt(in_f)
        kw, kb = jax.random.split(key)
        w = jax.random.uniform(kw, (out_f, in_f), jnp.float32, -bound, bound)
        b = jax.random.uniform(kb, (out_f,), jnp.float32, -bound, bound)
        return w, b

    keys = jax.random.split(key, 4)
    params = {}
    params["conv1_w"], params["conv1_b"] = conv_init(keys[0], 4, 1, 4)
    params["conv2_w"], params["conv2_b"] = conv_init(keys[1], 8, 4, 4)
    params["conv3_w"], params["conv3_b"] = conv_init(keys[2], 16, 8, 4)
    params["fc_w"], params["fc_b"] = linear_init(keys[3], 2, 16)
    # BatchNorm affine params (PyTorch defaults: weight=1, bias=0)
    params["bn1_g"], params["bn1_b"] = jnp.ones((4,)), jnp.zeros((4,))
    params["bn2_g"], params["bn2_b"] = jnp.ones((8,)), jnp.zeros((8,))
    params["bn3_g"], params["bn3_b"] = jnp.ones((16,)), jnp.zeros((16,))
    return params


if __name__ == "__main__":
    key = jax.random.PRNGKey(0)
    pkey, xkey = jax.random.split(key)
    params = init_params(pkey)
    # Spatial size 16 so three stride-3 k=4 p=1 convs reduce 16 -> 5 -> 2 -> 1,
    # making the flatten yield exactly 16 features for Linear(16, 2).
    x = jax.random.normal(xkey, (2, 1, 16, 16, 16), dtype=jnp.float32)

    out = simple_model_forward(params, x)
    out = jax.block_until_ready(out)
    assert out.shape == (2, 2), out.shape

    ref = jax.block_until_ready(_reference_forward(params, x))
    err = float(jnp.max(jnp.abs(out - ref)))
    # 3e-2 slack covers f32 MXU pass/summation-order differences; structural
    # bugs would show up as O(0.1+) errors.
    assert err < 3e-2, f"kernel mismatch vs reference, max abs err = {err}"

    print("KERNEL_OK")
</pallas_src>

<mosaic_0001>
module attributes {stable_mosaic.version = 11 : i64} {
  func.func @_fused_kernel(%arg0: i32, %arg1: memref<10x1600xf32, #tpu.memory_space<vmem>>, %arg2: memref<1600x256xf32, #tpu.memory_space<vmem>>, %arg3: memref<1x4xf32, #tpu.memory_space<vmem>>, %arg4: memref<1x4xf32, #tpu.memory_space<vmem>>, %arg5: memref<4x256xf32, #tpu.memory_space<vmem>>, %arg6: memref<256x4xf32, #tpu.memory_space<vmem>>, %arg7: memref<1280x64xf32, #tpu.memory_space<vmem>>, %arg8: memref<1x8xf32, #tpu.memory_space<vmem>>, %arg9: memref<1x8xf32, #tpu.memory_space<vmem>>, %arg10: memref<8x64xf32, #tpu.memory_space<vmem>>, %arg11: memref<64x8xf32, #tpu.memory_space<vmem>>, %arg12: memref<64x16xf32, #tpu.memory_space<vmem>>, %arg13: memref<1x16xf32, #tpu.memory_space<vmem>>, %arg14: memref<1x16xf32, #tpu.memory_space<vmem>>, %arg15: memref<16x2xf32, #tpu.memory_space<vmem>>, %arg16: memref<1x2xf32, #tpu.memory_space<vmem>>, %arg17: memref<2x2xf32, #tpu.memory_space<vmem>>) attributes {dimension_semantics = [#tpu.dimension_semantics<arbitrary>], iteration_bounds = array<i64: 1>, scalar_prefetch = 0 : i64, scratch_operands = 0 : i64, tpu.core_type = #tpu.core_type<tc>, window_params = [{pipeline_mode = #tpu.pipeline_mode<synchronous>, transform_indices = @transform_0, window_bounds = array<i64: 10, 1600>}, {pipeline_mode = #tpu.pipeline_mode<synchronous>, transform_indices = @transform_1, window_bounds = array<i64: 1600, 256>}, {pipeline_mode = #tpu.pipeline_mode<synchronous>, transform_indices = @transform_2, window_bounds = array<i64: 1, 4>}, {pipeline_mode = #tpu.pipeline_mode<synchronous>, transform_indices = @transform_3, window_bounds = array<i64: 1, 4>}, {pipeline_mode = #tpu.pipeline_mode<synchronous>, transform_indices = @transform_4, window_bounds = array<i64: 4, 256>}, {pipeline_mode = #tpu.pipeline_mode<synchronous>, transform_indices = @transform_5, window_bounds = array<i64: 256, 4>}, {pipeline_mode = #tpu.pipeline_mode<synchronous>, transform_indices = @transform_6, window_bounds = array<i64: 1280, 64>}, {pipeline_mode = #tpu.pipeline_mode<synchronous>, transform_indices = @transform_7, window_bounds = array<i64: 1, 8>}, {pipeline_mode = #tpu.pipeline_mode<synchronous>, transform_indices = @transform_8, window_bounds = array<i64: 1, 8>}, {pipeline_mode = #tpu.pipeline_mode<synchronous>, transform_indices = @transform_9, window_bounds = array<i64: 8, 64>}, {pipeline_mode = #tpu.pipeline_mode<synchronous>, transform_indices = @transform_10, window_bounds = array<i64: 64, 8>}, {pipeline_mode = #tpu.pipeline_mode<synchronous>, transform_indices = @transform_11, window_bounds = array<i64: 64, 16>}, {pipeline_mode = #tpu.pipeline_mode<synchronous>, transform_indices = @transform_12, window_bounds = array<i64: 1, 16>}, {pipeline_mode = #tpu.pipeline_mode<synchronous>, transform_indices = @transform_13, window_bounds = array<i64: 1, 16>}, {pipeline_mode = #tpu.pipeline_mode<synchronous>, transform_indices = @transform_14, window_bounds = array<i64: 16, 2>}, {pipeline_mode = #tpu.pipeline_mode<synchronous>, transform_indices = @transform_15, window_bounds = array<i64: 1, 2>}, {pipeline_mode = #tpu.pipeline_mode<synchronous>, transform_indices = @transform_16, window_bounds = array<i64: 2, 2>}]} {
    %c0 = arith.constant 0 : index
    %c0_0 = arith.constant 0 : index
    %0 = vector.load %arg1[%c0, %c0_0] : memref<10x1600xf32, #tpu.memory_space<vmem>>, vector<10x1600xf32>
    %c0_1 = arith.constant 0 : index
    %c0_2 = arith.constant 0 : index
    %1 = vector.load %arg2[%c0_1, %c0_2] : memref<1600x256xf32, #tpu.memory_space<vmem>>, vector<1600x256xf32>
    %cst = arith.constant dense<0.000000e+00> : vector<10x256xf32>
    %2 = tpu.matmul %0, %1, %cst {dimension_numbers = #tpu.dot_dimension_numbers<[1], [0], [0], [1], [0, 0, 1, 1], [], []>} : vector<10x1600xf32>, vector<1600x256xf32>, vector<10x256xf32> -> vector<10x256xf32>
    %cst_3 = arith.constant dense<0.000000e+00> : vector<256xf32>
    %3 = vector.multi_reduction <add>, %2, %cst_3 [0] : vector<10x256xf32> to vector<256xf32>
    %4 = vector.shape_cast %3 : vector<256xf32> to vector<1x256xf32>
    %5 = arith.mulf %2, %2 : vector<10x256xf32>
    %cst_4 = arith.constant dense<0.000000e+00> : vector<256xf32>
    %6 = vector.multi_reduction <add>, %5, %cst_4 [0] : vector<10x256xf32> to vector<256xf32>
    %7 = vector.shape_cast %6 : vector<256xf32> to vector<1x256xf32>
    %c0_5 = arith.constant 0 : index
    %c0_6 = arith.constant 0 : index
    %8 = vector.load %arg6[%c0_5, %c0_6] : memref<256x4xf32, #tpu.memory_space<vmem>>, vector<256x4xf32>
    %cst_7 = arith.constant dense<0.000000e+00> : vector<1x4xf32>
    %9 = tpu.matmul %4, %8, %cst_7 {dimension_numbers = #tpu.dot_dimension_numbers<[1], [0], [0], [1], [0, 0, 1, 1], [], []>} : vector<1x256xf32>, vector<256x4xf32>, vector<1x4xf32> -> vector<1x4xf32>
    %c0_8 = arith.constant 0 : index
    %c0_9 = arith.constant 0 : index
    %10 = vector.load %arg6[%c0_8, %c0_9] : memref<256x4xf32, #tpu.memory_space<vmem>>, vector<256x4xf32>
    %cst_10 = arith.constant dense<0.000000e+00> : vector<1x4xf32>
    %11 = tpu.matmul %7, %10, %cst_10 {dimension_numbers = #tpu.dot_dimension_numbers<[1], [0], [0], [1], [0, 0, 1, 1], [], []>} : vector<1x256xf32>, vector<256x4xf32>, vector<1x4xf32> -> vector<1x4xf32>
    %cst_11 = arith.constant 2.500000e+02 : f32
    %12 = vector.broadcast %cst_11 : f32 to vector<1x4xf32>
    %13 = arith.divf %9, %12 : vector<1x4xf32>
    %cst_12 = arith.constant 2.500000e+02 : f32
    %14 = vector.broadcast %cst_12 : f32 to vector<1x4xf32>
    %15 = arith.divf %11, %14 : vector<1x4xf32>
    %16 = arith.mulf %13, %13 : vector<1x4xf32>
    %17 = arith.subf %15, %16 : vector<1x4xf32>
    %c0_13 = arith.constant 0 : index
    %c0_14 = arith.constant 0 : index
    %18 = vector.load %arg3[%c0_13, %c0_14] : memref<1x4xf32, #tpu.memory_space<vmem>>, vector<1x4xf32>
    %cst_15 = arith.constant 9.99999974E-6 : f32
    %19 = vector.broadcast %cst_15 : f32 to vector<1x4xf32>
    %20 = arith.addf %17, %19 : vector<1x4xf32>
    %21 = math.rsqrt %20 : vector<1x4xf32>
    %22 = arith.mulf %18, %21 : vector<1x4xf32>
    %c0_16 = arith.constant 0 : index
    %c0_17 = arith.constant 0 : index
    %23 = vector.load %arg4[%c0_16, %c0_17] : memref<1x4xf32, #tpu.memory_space<vmem>>, vector<1x4xf32>
    %24 = arith.mulf %13, %22 : vector<1x4xf32>
    %25 = arith.subf %23, %24 : vector<1x4xf32>
    %c0_18 = arith.constant 0 : index
    %c0_19 = arith.constant 0 : index
    %26 = vector.load %arg5[%c0_18, %c0_19] : memref<4x256xf32, #tpu.memory_space<vmem>>, vector<4x256xf32>
    %cst_20 = arith.constant dense<0.000000e+00> : vector<1x256xf32>
    %27 = tpu.matmul %22, %26, %cst_20 {dimension_numbers = #tpu.dot_dimension_numbers<[1], [0], [0], [1], [0, 0, 1, 1], [], []>} : vector<1x4xf32>, vector<4x256xf32>, vector<1x256xf32> -> vector<1x256xf32>
    %c0_21 = arith.constant 0 : index
    %c0_22 = arith.constant 0 : index
    %28 = vector.load %arg5[%c0_21, %c0_22] : memref<4x256xf32, #tpu.memory_space<vmem>>, vector<4x256xf32>
    %cst_23 = arith.constant dense<0.000000e+00> : vector<1x256xf32>
    %29 = tpu.matmul %25, %28, %cst_23 {dimension_numbers = #tpu.dot_dimension_numbers<[1], [0], [0], [1], [0, 0, 1, 1], [], []>} : vector<1x4xf32>, vector<4x256xf32>, vector<1x256xf32> -> vector<1x256xf32>
    %30 = vector.broadcast %27 : vector<1x256xf32> to vector<10x256xf32>
    %31 = arith.mulf %2, %30 : vector<10x256xf32>
    %32 = vector.broadcast %29 : vector<1x256xf32> to vector<10x256xf32>
    %33 = arith.addf %31, %32 : vector<10x256xf32>
    %cst_24 = arith.constant 0.000000e+00 : f32
    %34 = vector.broadcast %cst_24 : f32 to vector<10x256xf32>
    %35 = arith.maximumf %33, %34 : vector<10x256xf32>
    %36 = vector.extract_strided_slice %35 {offsets = [0, 0], sizes = [2, 256], strides = [1, 1]} : vector<10x256xf32> to vector<2x256xf32>
    %37 = vector.extract_strided_slice %35 {offsets = [2, 0], sizes = [2, 256], strides = [1, 1]} : vector<10x256xf32> to vector<2x256xf32>
    %38 = vector.extract_strided_slice %35 {offsets = [4, 0], sizes = [2, 256], strides = [1, 1]} : vector<10x256xf32> to vector<2x256xf32>
    %39 = vector.extract_strided_slice %35 {offsets = [6, 0], sizes = [2, 256], strides = [1, 1]} : vector<10x256xf32> to vector<2x256xf32>
    %40 = vector.extract_strided_slice %35 {offsets = [8, 0], sizes = [2, 256], strides = [1, 1]} : vector<10x256xf32> to vector<2x256xf32>
    %41 = tpu.concatenate %36, %37, %38, %39, %40 in 1 : vector<2x256xf32>, vector<2x256xf32>, vector<2x256xf32>, vector<2x256xf32>, vector<2x256xf32> -> vector<2x1280xf32>
    %c0_25 = arith.constant 0 : index
    %c0_26 = arith.constant 0 : index
    %42 = vector.load %arg7[%c0_25, %c0_26] : memref<1280x64xf32, #tpu.memory_space<vmem>>, vector<1280x64xf32>
    %cst_27 = arith.constant dense<0.000000e+00> : vector<2x64xf32>
    %43 = tpu.matmul %41, %42, %cst_27 {dimension_numbers = #tpu.dot_dimension_numbers<[1], [0], [0], [1], [0, 0, 1, 1], [], []>} : vector<2x1280xf32>, vector<1280x64xf32>, vector<2x64xf32> -> vector<2x64xf32>
    %cst_28 = arith.constant dense<0.000000e+00> : vector<64xf32>
    %44 = vector.multi_reduction <add>, %43, %cst_28 [0] : vector<2x64xf32> to vector<64xf32>
    %45 = vector.shape_cast %44 : vector<64xf32> to vector<1x64xf32>
    %46 = arith.mulf %43, %43 : vector<2x64xf32>
    %cst_29 = arith.constant dense<0.000000e+00> : vector<64xf32>
    %47 = vector.multi_reduction <add>, %46, %cst_29 [0] : vector<2x64xf32> to vector<64xf32>
    %48 = vector.shape_cast %47 : vector<64xf32> to vector<1x64xf32>
    %c0_30 = arith.constant 0 : index
    %c0_31 = arith.constant 0 : index
    %49 = vector.load %arg11[%c0_30, %c0_31] : memref<64x8xf32, #tpu.memory_space<vmem>>, vector<64x8xf32>
    %cst_32 = arith.constant dense<0.000000e+00> : vector<1x8xf32>
    %50 = tpu.matmul %45, %49, %cst_32 {dimension_numbers = #tpu.dot_dimension_numbers<[1], [0], [0], [1], [0, 0, 1, 1], [], []>} : vector<1x64xf32>, vector<64x8xf32>, vector<1x8xf32> -> vector<1x8xf32>
    %c0_33 = arith.constant 0 : index
    %c0_34 = arith.constant 0 : index
    %51 = vector.load %arg11[%c0_33, %c0_34] : memref<64x8xf32, #tpu.memory_space<vmem>>, vector<64x8xf32>
    %cst_35 = arith.constant dense<0.000000e+00> : vector<1x8xf32>
    %52 = tpu.matmul %48, %51, %cst_35 {dimension_numbers = #tpu.dot_dimension_numbers<[1], [0], [0], [1], [0, 0, 1, 1], [], []>} : vector<1x64xf32>, vector<64x8xf32>, vector<1x8xf32> -> vector<1x8xf32>
    %cst_36 = arith.constant 1.600000e+01 : f32
    %53 = vector.broadcast %cst_36 : f32 to vector<1x8xf32>
    %54 = arith.divf %50, %53 : vector<1x8xf32>
    %cst_37 = arith.constant 1.600000e+01 : f32
    %55 = vector.broadcast %cst_37 : f32 to vector<1x8xf32>
    %56 = arith.divf %52, %55 : vector<1x8xf32>
    %57 = arith.mulf %54, %54 : vector<1x8xf32>
    %58 = arith.subf %56, %57 : vector<1x8xf32>
    %c0_38 = arith.constant 0 : index
    %c0_39 = arith.constant 0 : index
    %59 = vector.load %arg8[%c0_38, %c0_39] : memref<1x8xf32, #tpu.memory_space<vmem>>, vector<1x8xf32>
    %cst_40 = arith.constant 9.99999974E-6 : f32
    %60 = vector.broadcast %cst_40 : f32 to vector<1x8xf32>
    %61 = arith.addf %58, %60 : vector<1x8xf32>
    %62 = math.rsqrt %61 : vector<1x8xf32>
    %63 = arith.mulf %59, %62 : vector<1x8xf32>
    %c0_41 = arith.constant 0 : index
    %c0_42 = arith.constant 0 : index
    %64 = vector.load %arg9[%c0_41, %c0_42] : memref<1x8xf32, #tpu.memory_space<vmem>>, vector<1x8xf32>
    %65 = arith.mulf %54, %63 : vector<1x8xf32>
    %66 = arith.subf %64, %65 : vector<1x8xf32>
    %c0_43 = arith.constant 0 : index
    %c0_44 = arith.constant 0 : index
    %67 = vector.load %arg10[%c0_43, %c0_44] : memref<8x64xf32, #tpu.memory_space<vmem>>, vector<8x64xf32>
    %cst_45 = arith.constant dense<0.000000e+00> : vector<1x64xf32>
    %68 = tpu.matmul %63, %67, %cst_45 {dimension_numbers = #tpu.dot_dimension_numbers<[1], [0], [0], [1], [0, 0, 1, 1], [], []>} : vector<1x8xf32>, vector<8x64xf32>, vector<1x64xf32> -> vector<1x64xf32>
    %c0_46 = arith.constant 0 : index
    %c0_47 = arith.constant 0 : index
    %69 = vector.load %arg10[%c0_46, %c0_47] : memref<8x64xf32, #tpu.memory_space<vmem>>, vector<8x64xf32>
    %cst_48 = arith.constant dense<0.000000e+00> : vector<1x64xf32>
    %70 = tpu.matmul %66, %69, %cst_48 {dimension_numbers = #tpu.dot_dimension_numbers<[1], [0], [0], [1], [0, 0, 1, 1], [], []>} : vector<1x8xf32>, vector<8x64xf32>, vector<1x64xf32> -> vector<1x64xf32>
    %71 = vector.broadcast %68 : vector<1x64xf32> to vector<2x64xf32>
    %72 = arith.mulf %43, %71 : vector<2x64xf32>
    %73 = vector.broadcast %70 : vector<1x64xf32> to vector<2x64xf32>
    %74 = arith.addf %72, %73 : vector<2x64xf32>
    %cst_49 = arith.constant 0.000000e+00 : f32
    %75 = vector.broadcast %cst_49 : f32 to vector<2x64xf32>
    %76 = arith.maximumf %74, %75 : vector<2x64xf32>
    %c0_50 = arith.constant 0 : index
    %c0_51 = arith.constant 0 : index
    %77 = vector.load %arg12[%c0_50, %c0_51] : memref<64x16xf32, #tpu.memory_space<vmem>>, vector<64x16xf32>
    %cst_52 = arith.constant dense<0.000000e+00> : vector<2x16xf32>
    %78 = tpu.matmul %76, %77, %cst_52 {dimension_numbers = #tpu.dot_dimension_numbers<[1], [0], [0], [1], [0, 0, 1, 1], [], []>} : vector<2x64xf32>, vector<64x16xf32>, vector<2x16xf32> -> vector<2x16xf32>
    %cst_53 = arith.constant dense<0.000000e+00> : vector<16xf32>
    %79 = vector.multi_reduction <add>, %78, %cst_53 [0] : vector<2x16xf32> to vector<16xf32>
    %80 = vector.shape_cast %79 : vector<16xf32> to vector<1x16xf32>
    %cst_54 = arith.constant 2.000000e+00 : f32
    %81 = vector.broadcast %cst_54 : f32 to vector<1x16xf32>
    %82 = arith.divf %80, %81 : vector<1x16xf32>
    %83 = arith.mulf %78, %78 : vector<2x16xf32>
    %cst_55 = arith.constant dense<0.000000e+00> : vector<16xf32>
    %84 = vector.multi_reduction <add>, %83, %cst_55 [0] : vector<2x16xf32> to vector<16xf32>
    %85 = vector.shape_cast %84 : vector<16xf32> to vector<1x16xf32>
    %cst_56 = arith.constant 2.000000e+00 : f32
    %86 = vector.broadcast %cst_56 : f32 to vector<1x16xf32>
    %87 = arith.divf %85, %86 : vector<1x16xf32>
    %88 = arith.mulf %82, %82 : vector<1x16xf32>
    %89 = arith.subf %87, %88 : vector<1x16xf32>
    %c0_57 = arith.constant 0 : index
    %c0_58 = arith.constant 0 : index
    %90 = vector.load %arg13[%c0_57, %c0_58] : memref<1x16xf32, #tpu.memory_space<vmem>>, vector<1x16xf32>
    %cst_59 = arith.constant 9.99999974E-6 : f32
    %91 = vector.broadcast %cst_59 : f32 to vector<1x16xf32>
    %92 = arith.addf %89, %91 : vector<1x16xf32>
    %93 = math.rsqrt %92 : vector<1x16xf32>
    %94 = arith.mulf %90, %93 : vector<1x16xf32>
    %c0_60 = arith.constant 0 : index
    %c0_61 = arith.constant 0 : index
    %95 = vector.load %arg14[%c0_60, %c0_61] : memref<1x16xf32, #tpu.memory_space<vmem>>, vector<1x16xf32>
    %96 = arith.mulf %82, %94 : vector<1x16xf32>
    %97 = arith.subf %95, %96 : vector<1x16xf32>
    %98 = vector.broadcast %94 : vector<1x16xf32> to vector<2x16xf32>
    %99 = arith.mulf %78, %98 : vector<2x16xf32>
    %100 = vector.broadcast %97 : vector<1x16xf32> to vector<2x16xf32>
    %101 = arith.addf %99, %100 : vector<2x16xf32>
    %cst_62 = arith.constant 0.000000e+00 : f32
    %102 = vector.broadcast %cst_62 : f32 to vector<2x16xf32>
    %103 = arith.maximumf %101, %102 : vector<2x16xf32>
    %c0_63 = arith.constant 0 : index
    %c0_64 = arith.constant 0 : index
    %104 = vector.load %arg15[%c0_63, %c0_64] : memref<16x2xf32, #tpu.memory_space<vmem>>, vector<16x2xf32>
    %cst_65 = arith.constant dense<0.000000e+00> : vector<2x2xf32>
    %105 = tpu.matmul %103, %104, %cst_65 {dimension_numbers = #tpu.dot_dimension_numbers<[1], [0], [0], [1], [0, 0, 1, 1], [], []>} : vector<2x16xf32>, vector<16x2xf32>, vector<2x2xf32> -> vector<2x2xf32>
    %c0_66 = arith.constant 0 : index
    %c0_67 = arith.constant 0 : index
    %106 = vector.load %arg16[%c0_66, %c0_67] : memref<1x2xf32, #tpu.memory_space<vmem>>, vector<1x2xf32>
    %107 = vector.broadcast %106 : vector<1x2xf32> to vector<2x2xf32>
    %108 = arith.addf %105, %107 : vector<2x2xf32>
    %c0_68 = arith.constant 0 : index
    %c0_69 = arith.constant 0 : index
    %109 = vector.load %arg17[%c0_68, %c0_69] : memref<2x2xf32, #tpu.memory_space<vmem>>, vector<2x2xf32>
    tpu.vector_store %arg17[%c0_68, %c0_69], %108 {strides = array<i32>} : memref<2x2xf32, #tpu.memory_space<vmem>>, vector<2x2xf32>,
    return
  }
  func.func @transform_0(%arg0: i32) -> (i32, i32) {
    %c0_i32 = arith.constant 0 : i32
    %c0_i32_0 = arith.constant 0 : i32
    %c0_i32_1 = arith.constant 0 : i32
    return %c0_i32, %c0_i32_0 : i32, i32
  }
  func.func @transform_1(%arg0: i32) -> (i32, i32) {
    %c0_i32 = arith.constant 0 : i32
    %c0_i32_0 = arith.constant 0 : i32
    %c0_i32_1 = arith.constant 0 : i32
    return %c0_i32, %c0_i32_0 : i32, i32
  }
  func.func @transform_2(%arg0: i32) -> (i32, i32) {
    %c0_i32 = arith.constant 0 : i32
    %c0_i32_0 = arith.constant 0 : i32
    %c0_i32_1 = arith.constant 0 : i32
    return %c0_i32, %c0_i32_0 : i32, i32
  }
  func.func @transform_3(%arg0: i32) -> (i32, i32) {
    %c0_i32 = arith.constant 0 : i32
    %c0_i32_0 = arith.constant 0 : i32
    %c0_i32_1 = arith.constant 0 : i32
    return %c0_i32, %c0_i32_0 : i32, i32
  }
  func.func @transform_4(%arg0: i32) -> (i32, i32) {
    %c0_i32 = arith.constant 0 : i32
    %c0_i32_0 = arith.constant 0 : i32
    %c0_i32_1 = arith.constant 0 : i32
    return %c0_i32, %c0_i32_0 : i32, i32
  }
  func.func @transform_5(%arg0: i32) -> (i32, i32) {
    %c0_i32 = arith.constant 0 : i32
    %c0_i32_0 = arith.constant 0 : i32
    %c0_i32_1 = arith.constant 0 : i32
    return %c0_i32, %c0_i32_0 : i32, i32
  }
  func.func @transform_6(%arg0: i32) -> (i32, i32) {
    %c0_i32 = arith.constant 0 : i32
    %c0_i32_0 = arith.constant 0 : i32
    %c0_i32_1 = arith.constant 0 : i32
    return %c0_i32, %c0_i32_0 : i32, i32
  }
  func.func @transform_7(%arg0: i32) -> (i32, i32) {
    %c0_i32 = arith.constant 0 : i32
    %c0_i32_0 = arith.constant 0 : i32
    %c0_i32_1 = arith.constant 0 : i32
    return %c0_i32, %c0_i32_0 : i32, i32
  }
  func.func @transform_8(%arg0: i32) -> (i32, i32) {
    %c0_i32 = arith.constant 0 : i32
    %c0_i32_0 = arith.constant 0 : i32
    %c0_i32_1 = arith.constant 0 : i32
    return %c0_i32, %c0_i32_0 : i32, i32
  }
  func.func @transform_9(%arg0: i32) -> (i32, i32) {
    %c0_i32 = arith.constant 0 : i32
    %c0_i32_0 = arith.constant 0 : i32
    %c0_i32_1 = arith.constant 0 : i32
    return %c0_i32, %c0_i32_0 : i32, i32
  }
  func.func @transform_10(%arg0: i32) -> (i32, i32) {
    %c0_i32 = arith.constant 0 : i32
    %c0_i32_0 = arith.constant 0 : i32
    %c0_i32_1 = arith.constant 0 : i32
    return %c0_i32, %c0_i32_0 : i32, i32
  }
  func.func @transform_11(%arg0: i32) -> (i32, i32) {
    %c0_i32 = arith.constant 0 : i32
    %c0_i32_0 = arith.constant 0 : i32
    %c0_i32_1 = arith.constant 0 : i32
    return %c0_i32, %c0_i32_0 : i32, i32
  }
  func.func @transform_12(%arg0: i32) -> (i32, i32) {
    %c0_i32 = arith.constant 0 : i32
    %c0_i32_0 = arith.constant 0 : i32
    %c0_i32_1 = arith.constant 0 : i32
    return %c0_i32, %c0_i32_0 : i32, i32
  }
  func.func @transform_13(%arg0: i32) -> (i32, i32) {
    %c0_i32 = arith.constant 0 : i32
    %c0_i32_0 = arith.constant 0 : i32
    %c0_i32_1 = arith.constant 0 : i32
    return %c0_i32, %c0_i32_0 : i32, i32
  }
  func.func @transform_14(%arg0: i32) -> (i32, i32) {
    %c0_i32 = arith.constant 0 : i32
    %c0_i32_0 = arith.constant 0 : i32
    %c0_i32_1 = arith.constant 0 : i32
    return %c0_i32, %c0_i32_0 : i32, i32
  }
  func.func @transform_15(%arg0: i32) -> (i32, i32) {
    %c0_i32 = arith.constant 0 : i32
    %c0_i32_0 = arith.constant 0 : i32
    %c0_i32_1 = arith.constant 0 : i32
    return %c0_i32, %c0_i32_0 : i32, i32
  }
  func.func @transform_16(%arg0: i32) -> (i32, i32) {
    %c0_i32 = arith.constant 0 : i32
    %c0_i32_0 = arith.constant 0 : i32
    %c0_i32_1 = arith.constant 0 : i32
    return %c0_i32, %c0_i32_0 : i32, i32
  }
}

</mosaic_0001>

<bundles_post_ra>
// kernel: mul.91
= control target key start
LH: loop header
LB: loop body
LE: loop exit
PB: predicated region body
PF: predicated region fallthrough
CT: control target
= control target key end

     0   :  { %s34_s0 = inlined_call_operand.vmem [shape: f32[49], index: 0, kind: input, shape index: {}]   ;;  %s35_s1 = inlined_call_operand.vmem [shape: f32[49], index: 1, kind: input, shape index: {}]   ;;  %s36_s2 = inlined_call_operand.vmem [shape: f32[49], index: 2, kind: output, shape index: {}]  }
   0x1   :  { %v3_v0 = vld [vmem:[%s34_s0] sm:$0x1] }
   0x2   :  { %v4_v1 = vld [vmem:[%s35_s1] sm:$0x1] }
   0x3   :  { %v7_v2 = vmul.f32 %v4_v1, %v3_v0 }
   0x5   :  { %9 = vst [vmem:[%s36_s2] sm:$0x1] %v7_v2 }

// kernel: simple_model_forward.1
= control target key start
LH: loop header
LB: loop body
LE: loop exit
PB: predicated region body
PF: predicated region fallthrough
CT: control target
= control target key end

     0   :  { %s5060_s0 = inlined_call_operand.vmem [shape: f32[10,1600], index: 0, kind: input, shape index: {}]   ;;  %s5061_s1 = inlined_call_operand.vmem [shape: f32[1600,256], index: 1, kind: input, shape index: {}]   ;;  %s5062_s2 = inlined_call_operand.vmem [shape: f32[1,4], index: 2, kind: input, shape index: {}]   ;;  %s5063_s3 = inlined_call_operand.vmem [shape: f32[1,4], index: 3, kind: input, shape index: {}]   ;;  %s5064_s4 = inlined_call_operand.vmem [shape: f32[4,256], index: 4, kind: input, shape index: {}]   ;;  %s5065_s5 = inlined_call_operand.vmem [shape: f32[256,4], index: 5, kind: input, shape index: {}]   ;;  %s5066_s6 = inlined_call_operand.vmem [shape: f32[1280,64], index: 6, kind: input, shape index: {}]   ;;  %s5067_s7 = inlined_call_operand.vmem [shape: f32[1,8], index: 7, kind: input, shape index: {}]   ;;  %s5068_s8 = inlined_call_operand.vmem [shape: f32[1,8], index: 8, kind: input, shape index: {}]   ;;  %s5069_s9 = inlined_call_operand.vmem [shape: f32[8,64], index: 9, kind: input, shape index: {}]   ;;  %s5070_s10 = inlined_call_operand.vmem [shape: f32[64,8], index: 10, kind: input, shape index: {}]   ;;  %s5071_s11 = inlined_call_operand.vmem [shape: f32[64,16], index: 11, kind: input, shape index: {}]   ;;  %s5072_s12 = inlined_call_operand.vmem [shape: f32[1,16], index: 12, kind: input, shape index: {}]   ;;  %s5073_s13 = inlined_call_operand.vmem [shape: f32[1,16], index: 13, kind: input, shape index: {}]   ;;  %s5074_s14 = inlined_call_operand.vmem [shape: f32[16,2], index: 14, kind: input, shape index: {}]   ;;  %s5075_s15 = inlined_call_operand.vmem [shape: f32[1,2], index: 15, kind: input, shape index: {}]   ;;  %s5076_s16 = inlined_call_operand.hbm [shape: f32[2,2], index: 16, kind: output, shape index: {}]  }
   0x1   :  { %5078 = sst [smem:[#allocation5_spill]] %s5060_s0 }
   0x2   :  { %v111_v0 = vld [vmem:[%s5061_s1 + $0xf8] sm:$0xff]  ;;  %v110_v2 = vld [vmem:[%s5061_s1 + $0xf0] sm:$0xff]  ;;  %v109_v4 = vld [vmem:[%s5061_s1 + $0xe8] sm:$0xff]  ;;  %s5079_s22 = sld [smem:[#allocation5_spill]] }
   0x3   :  { %v175_v1 = vld [vmem:[%s5061_s1 + $0x2f8] sm:$0xff]  ;;  %487 = vmatprep.subr.mxu0 %v111_v0  ;;  %v174_v3 = vld [vmem:[%s5061_s1 + $0x2f0] sm:$0xff]  ;;  %v173_v5 = vld [vmem:[%s5061_s1 + $0x2e8] sm:$0xff] }
   0x4   :  { %564 = vmatprep.subr.mxu1 %v175_v1  ;;  %488 = vmatpush1.msra.mxu0 %v110_v2  ;;  %v108_v6 = vld [vmem:[%s5061_s1 + $0xe0] sm:$0xff]  ;;  %v107_v8 = vld [vmem:[%s5061_s1 + $0xd8] sm:$0xff]  ;;  %v106_v10 = vld [vmem:[%s5061_s1 + $0xd0] sm:$0xff] }
   0x5   :  { %565 = vmatpush1.msra.mxu1 %v174_v3  ;;  %v172_v7 = vld [vmem:[%s5061_s1 + $0x2e0] sm:$0xff]  ;;  %489 = vmatprep.subr.mxu0 %v109_v4  ;;  %v171_v9 = vld [vmem:[%s5061_s1 + $0x2d8] sm:$0xff]  ;;  %v170_v11 = vld [vmem:[%s5061_s1 + $0x2d0] sm:$0xff] }
   0x6   :  { %566 = vmatprep.subr.mxu1 %v173_v5  ;;  %490 = vmatpush1.msra.mxu0 %v108_v6  ;;  %v105_v12 = vld [vmem:[%s5061_s1 + $0xc8] sm:$0xff]  ;;  %v104_v14 = vld [vmem:[%s5061_s1 + $0xc0] sm:$0xff]  ;;  %v103_v16 = vld [vmem:[%s5061_s1 + $0xb8] sm:$0xff] }
   0x7   :  { %567 = vmatpush1.msra.mxu1 %v172_v7  ;;  %v169_v13 = vld [vmem:[%s5061_s1 + $0x2c8] sm:$0xff]  ;;  %491 = vmatprep.subr.mxu0 %v107_v8  ;;  %v168_v15 = vld [vmem:[%s5061_s1 + $0x2c0] sm:$0xff]  ;;  %v167_v17 = vld [vmem:[%s5061_s1 + $0x2b8] sm:$0xff] }
   0x8   :  { %568 = vmatprep.subr.mxu1 %v171_v9  ;;  %492 = vmatpush1.msra.mxu0 %v106_v10  ;;  %v102_v18 = vld [vmem:[%s5061_s1 + $0xb0] sm:$0xff]  ;;  %v101_v20 = vld [vmem:[%s5061_s1 + $0xa8] sm:$0xff]  ;;  %v100_v22 = vld [vmem:[%s5061_s1 + $0xa0] sm:$0xff] }
   0x9   :  { %569 = vmatpush1.msra.mxu1 %v170_v11  ;;  %493 = vmatprep.subr.mxu0 %v105_v12  ;;  %v166_v19 = vld [vmem:[%s5061_s1 + $0x2b0] sm:$0xff]  ;;  %v165_v21 = vld [vmem:[%s5061_s1 + $0x2a8] sm:$0xff]  ;;  %v164_v23 = vld [vmem:[%s5061_s1 + $0x2a0] sm:$0xff] }
   0xa   :  { %570 = vmatprep.subr.mxu1 %v169_v13  ;;  %494 = vmatpush1.msra.mxu0 %v104_v14  ;;  %v99_v24 = vld [vmem:[%s5061_s1 + $0x98] sm:$0xff]  ;;  %v98_v26 = vld [vmem:[%s5061_s1 + $0x90] sm:$0xff]  ;;  %v97_v28 = vld [vmem:[%s5061_s1 + $0x88] sm:$0xff] }
   0xb   :  { %571 = vmatpush1.msra.mxu1 %v168_v15  ;;  %495 = vmatprep.subr.mxu0 %v103_v16  ;;  %v163_v25 = vld [vmem:[%s5061_s1 + $0x298] sm:$0xff]  ;;  %v162_v27 = vld [vmem:[%s5061_s1 + $0x290] sm:$0xff]  ;;  %v161_v29 = vld [vmem:[%s5061_s1 + $0x288] sm:$0xff] }
   0xc   :  { %572 = vmatprep.subr.mxu1 %v167_v17  ;;  %496 = vmatpush1.msra.mxu0 %v102_v18  ;;  %v96_v30 = vld [vmem:[%s5061_s1 + $0x80] sm:$0xff]  ;;  %v95_v32 = vld [vmem:[%s5061_s1 + $0x78] sm:$0xff]  ;;  %v94_v34 = vld [vmem:[%s5061_s1 + $0x70] sm:$0xff] }
   0xd   :  { %573 = vmatpush1.msra.mxu1 %v166_v19  ;;  %497 = vmatprep.subr.mxu0 %v101_v20  ;;  %v160_v31 = vld [vmem:[%s5061_s1 + $0x280] sm:$0xff]  ;;  %v159_v33 = vld [vmem:[%s5061_s1 + $0x278] sm:$0xff]  ;;  %v158_v35 = vld [vmem:[%s5061_s1 + $0x270] sm:$0xff] }
   0xe   :  { %574 = vmatprep.subr.mxu1 %v165_v21  ;;  %498 = vmatpush1.msra.mxu0 %v100_v22  ;;  %v93_v36 = vld [vmem:[%s5061_s1 + $0x68] sm:$0xff]  ;;  %v92_v38 = vld [vmem:[%s5061_s1 + $0x60] sm:$0xff]  ;;  %v91_v40 = vld [vmem:[%s5061_s1 + $0x58] sm:$0xff] }
   0xf   :  { %575 = vmatpush1.msra.mxu1 %v164_v23  ;;  %499 = vmatprep.subr.mxu0 %v99_v24  ;;  %v157_v37 = vld [vmem:[%s5061_s1 + $0x268] sm:$0xff]  ;;  %v156_v39 = vld [vmem:[%s5061_s1 + $0x260] sm:$0xff]  ;;  %v155_v41 = vld [vmem:[%s5061_s1 + $0x258] sm:$0xff] }
  0x10   :  { %576 = vmatprep.subr.mxu1 %v163_v25  ;;  %500 = vmatpush1.msra.mxu0 %v98_v26  ;;  %v90_v42 = vld [vmem:[%s5061_s1 + $0x50] sm:$0xff]  ;;  %v89_v44 = vld [vmem:[%s5061_s1 + $0x48] sm:$0xff]  ;;  %v88_v46 = vld [vmem:[%s5061_s1 + $0x40] sm:$0xff] }
  0x11   :  { %577 = vmatpush1.msra.mxu1 %v162_v27  ;;  %501 = vmatprep.subr.mxu0 %v97_v28  ;;  %v154_v43 = vld [vmem:[%s5061_s1 + $0x250] sm:$0xff]  ;;  %v153_v45 = vld [vmem:[%s5061_s1 + $0x248] sm:$0xff]  ;;  %v152_v47 = vld [vmem:[%s5061_s1 + $0x240] sm:$0xff] }
  0x12   :  { %578 = vmatprep.subr.mxu1 %v161_v29  ;;  %502 = vmatpush1.msra.mxu0 %v96_v30  ;;  %v87_v48 = vld [vmem:[%s5061_s1 + $0x38] sm:$0xff]  ;;  %v86_v50 = vld [vmem:[%s5061_s1 + $0x30] sm:$0xff]  ;;  %v85_v52 = vld [vmem:[%s5061_s1 + $0x28] sm:$0xff] }
  0x13   :  { %579 = vmatpush1.msra.mxu1 %v160_v31  ;;  %503 = vmatprep.subr.mxu0 %v95_v32  ;;  %v151_v49 = vld [vmem:[%s5061_s1 + $0x238] sm:$0xff]  ;;  %v150_v51 = vld [vmem:[%s5061_s1 + $0x230] sm:$0xff]  ;;  %v149_v53 = vld [vmem:[%s5061_s1 + $0x228] sm:$0xff] }
  0x14   :  { %580 = vmatprep.subr.mxu1 %v159_v33  ;;  %504 = vmatpush1.msra.mxu0 %v94_v34  ;;  %v84_v54 = vld [vmem:[%s5061_s1 + $0x20] sm:$0xff]  ;;  %v83_v56 = vld [vmem:[%s5061_s1 + $0x18] sm:$0xff]  ;;  %v82_v58 = vld [vmem:[%s5061_s1 + $0x10] sm:$0xff] }
  0x15   :  { %581 = vmatpush1.msra.mxu1 %v158_v35  ;;  %505 = vmatprep.subr.mxu0 %v93_v36  ;;  %v148_v55 = vld [vmem:[%s5061_s1 + $0x220] sm:$0xff]  ;;  %v147_v57 = vld [vmem:[%s5061_s1 + $0x218] sm:$0xff]  ;;  %v146_v59 = vld [vmem:[%s5061_s1 + $0x210] sm:$0xff] }
  0x16   :  { %582 = vmatprep.subr.mxu1 %v157_v37  ;;  %506 = vmatpush1.msra.mxu0 %v92_v38  ;;  %v81_v60 = vld [vmem:[%s5061_s1 + $0x8] sm:$0xff]  ;;  %v80_v62 = vld [vmem:[%s5061_s1] sm:$0xff]  ;;  %v143_v0 = vld [vmem:[%s5061_s1 + $0x1f8] sm:$0xff] }
  0x17   :  { %583 = vmatpush1.msra.mxu1 %v156_v39  ;;  %507 = vmatprep.subr.mxu0 %v91_v40  ;;  %v145_v61 = vld [vmem:[%s5061_s1 + $0x208] sm:$0xff]  ;;  %v144_v63 = vld [vmem:[%s5061_s1 + $0x200] sm:$0xff]  ;;  %v207_v1 = vld [vmem:[%s5061_s1 + $0x3f8] sm:$0xff] }
  0x18   :  { %584 = vmatprep.subr.mxu1 %v155_v41  ;;  %508 = vmatpush1.msra.mxu0 %v90_v42  ;;  %v142_v2 = vld [vmem:[%s5061_s1 + $0x1f0] sm:$0xff]  ;;  %v141_v4 = vld [vmem:[%s5061_s1 + $0x1e8] sm:$0xff]  ;;  %v140_v6 = vld [vmem:[%s5061_s1 + $0x1e0] sm:$0xff] }
  0x19   :  { %585 = vmatpush1.msra.mxu1 %v154_v43  ;;  %509 = vmatprep.subr.mxu0 %v89_v44  ;;  %v206_v3 = vld [vmem:[%s5061_s1 + $0x3f0] sm:$0xff]  ;;  %v205_v5 = vld [vmem:[%s5061_s1 + $0x3e8] sm:$0xff]  ;;  %v204_v7 = vld [vmem:[%s5061_s1 + $0x3e0] sm:$0xff] }
  0x1a   :  { %586 = vmatprep.subr.mxu1 %v153_v45  ;;  %510 = vmatpush1.msra.mxu0 %v88_v46  ;;  %v139_v8 = vld [vmem:[%s5061_s1 + $0x1d8] sm:$0xff]  ;;  %v138_v10 = vld [vmem:[%s5061_s1 + $0x1d0] sm:$0xff]  ;;  %v137_v12 = vld [vmem:[%s5061_s1 + $0x1c8] sm:$0xff] }
  0x1b   :  { %587 = vmatpush1.msra.mxu1 %v152_v47  ;;  %511 = vmatprep.subr.mxu0 %v87_v48  ;;  %v203_v9 = vld [vmem:[%s5061_s1 + $0x3d8] sm:$0xff]  ;;  %v202_v11 = vld [vmem:[%s5061_s1 + $0x3d0] sm:$0xff]  ;;  %v201_v13 = vld [vmem:[%s5061_s1 + $0x3c8] sm:$0xff] }
  0x1c   :  { %588 = vmatprep.subr.mxu1 %v151_v49  ;;  %512 = vmatpush1.msra.mxu0 %v86_v50  ;;  %v136_v14 = vld [vmem:[%s5061_s1 + $0x1c0] sm:$0xff]  ;;  %v135_v16 = vld [vmem:[%s5061_s1 + $0x1b8] sm:$0xff]  ;;  %v134_v18 = vld [vmem:[%s5061_s1 + $0x1b0] sm:$0xff] }
  0x1d   :  { %589 = vmatpush1.msra.mxu1 %v150_v51  ;;  %513 = vmatprep.subr.mxu0 %v85_v52  ;;  %v200_v15 = vld [vmem:[%s5061_s1 + $0x3c0] sm:$0xff]  ;;  %v199_v17 = vld [vmem:[%s5061_s1 + $0x3b8] sm:$0xff]  ;;  %v198_v19 = vld [vmem:[%s5061_s1 + $0x3b0] sm:$0xff] }
  0x1e   :  { %590 = vmatprep.subr.mxu1 %v149_v53  ;;  %514 = vmatpush1.msra.mxu0 %v84_v54  ;;  %v133_v20 = vld [vmem:[%s5061_s1 + $0x1a8] sm:$0xff]  ;;  %v132_v22 = vld [vmem:[%s5061_s1 + $0x1a0] sm:$0xff]  ;;  %v131_v24 = vld [vmem:[%s5061_s1 + $0x198] sm:$0xff] }
  0x1f   :  { %591 = vmatpush1.msra.mxu1 %v148_v55  ;;  %515 = vmatprep.subr.mxu0 %v83_v56  ;;  %v197_v21 = vld [vmem:[%s5061_s1 + $0x3a8] sm:$0xff]  ;;  %v196_v23 = vld [vmem:[%s5061_s1 + $0x3a0] sm:$0xff]  ;;  %v195_v25 = vld [vmem:[%s5061_s1 + $0x398] sm:$0xff] }
  0x20   :  { %592 = vmatprep.subr.mxu1 %v147_v57  ;;  %516 = vmatpush1.msra.mxu0 %v82_v58  ;;  %v130_v26 = vld [vmem:[%s5061_s1 + $0x190] sm:$0xff]  ;;  %v129_v28 = vld [vmem:[%s5061_s1 + $0x188] sm:$0xff]  ;;  %v128_v30 = vld [vmem:[%s5061_s1 + $0x180] sm:$0xff] }
  0x21   :  { %593 = vmatpush1.msra.mxu1 %v146_v59  ;;  %517 = vmatprep.subr.mxu0 %v81_v60  ;;  %v194_v27 = vld [vmem:[%s5061_s1 + $0x390] sm:$0xff]  ;;  %v193_v29 = vld [vmem:[%s5061_s1 + $0x388] sm:$0xff]  ;;  %v192_v31 = vld [vmem:[%s5061_s1 + $0x380] sm:$0xff] }
  0x22   :  { %594 = vmatprep.subr.mxu1 %v145_v61  ;;  %518 = vmatpush1.msra.mxu0 %v80_v62  ;;  %v127_v32 = vld [vmem:[%s5061_s1 + $0x178] sm:$0xff]  ;;  %v126_v34 = vld [vmem:[%s5061_s1 + $0x170] sm:$0xff]  ;;  %v125_v36 = vld [vmem:[%s5061_s1 + $0x168] sm:$0xff] }
  0x23   :  { %595 = vmatpush1.msra.mxu1 %v144_v63  ;;  %519 = vmatprep.subr.mxu0 %v143_v0  ;;  %v191_v33 = vld [vmem:[%s5061_s1 + $0x378] sm:$0xff]  ;;  %v190_v35 = vld [vmem:[%s5061_s1 + $0x370] sm:$0xff]  ;;  %v189_v37 = vld [vmem:[%s5061_s1 + $0x368] sm:$0xff] }
  0x24   :  { %596 = vmatprep.subr.mxu1 %v207_v1  ;;  %520 = vmatpush2.msra.mxu0 %v142_v2  ;;  %v124_v38 = vld [vmem:[%s5061_s1 + $0x160] sm:$0xff]  ;;  %v123_v40 = vld [vmem:[%s5061_s1 + $0x158] sm:$0xff]  ;;  %v122_v42 = vld [vmem:[%s5061_s1 + $0x150] sm:$0xff] }
  0x25   :  { %597 = vmatpush2.msra.mxu1 %v206_v3  ;;  %521 = vmatprep.subr.mxu0 %v141_v4  ;;  %v188_v39 = vld [vmem:[%s5061_s1 + $0x360] sm:$0xff]  ;;  %v187_v41 = vld [vmem:[%s5061_s1 + $0x358] sm:$0xff]  ;;  %v186_v43 = vld [vmem:[%s5061_s1 + $0x350] sm:$0xff] }
  0x26   :  { %598 = vmatprep.subr.mxu1 %v205_v5  ;;  %522 = vmatpush2.msra.mxu0 %v140_v6  ;;  %v121_v44 = vld [vmem:[%s5061_s1 + $0x148] sm:$0xff]  ;;  %v120_v46 = vld [vmem:[%s5061_s1 + $0x140] sm:$0xff]  ;;  %v119_v48 = vld [vmem:[%s5061_s1 + $0x138] sm:$0xff] }
  0x27   :  { %599 = vmatpush2.msra.mxu1 %v204_v7  ;;  %523 = vmatprep.subr.mxu0 %v139_v8  ;;  %v185_v45 = vld [vmem:[%s5061_s1 + $0x348] sm:$0xff]  ;;  %v184_v47 = vld [vmem:[%s5061_s1 + $0x340] sm:$0xff]  ;;  %v183_v49 = vld [vmem:[%s5061_s1 + $0x338] sm:$0xff] }
  0x28   :  { %600 = vmatprep.subr.mxu1 %v203_v9  ;;  %524 = vmatpush2.msra.mxu0 %v138_v10  ;;  %v118_v50 = vld [vmem:[%s5061_s1 + $0x130] sm:$0xff]  ;;  %v117_v52 = vld [vmem:[%s5061_s1 + $0x128] sm:$0xff]  ;;  %v116_v54 = vld [vmem:[%s5061_s1 + $0x120] sm:$0xff] }
  0x29   :  { %601 = vmatpush2.msra.mxu1 %v202_v11  ;;  %525 = vmatprep.subr.mxu0 %v137_v12  ;;  %v182_v51 = vld [vmem:[%s5061_s1 + $0x330] sm:$0xff]  ;;  %v181_v53 = vld [vmem:[%s5061_s1 + $0x328] sm:$0xff]  ;;  %v180_v55 = vld [vmem:[%s5061_s1 + $0x320] sm:$0xff] }
  0x2a   :  { %602 = vmatprep.subr.mxu1 %v201_v13  ;;  %526 = vmatpush2.msra.mxu0 %v136_v14  ;;  %v115_v56 = vld [vmem:[%s5061_s1 + $0x118] sm:$0xff]  ;;  %v114_v58 = vld [vmem:[%s5061_s1 + $0x110] sm:$0xff]  ;;  %v113_v60 = vld [vmem:[%s5061_s1 + $0x108] sm:$0xff] }
  0x2b   :  { %603 = vmatpush2.msra.mxu1 %v200_v15  ;;  %527 = vmatprep.subr.mxu0 %v135_v16  ;;  %v179_v57 = vld [vmem:[%s5061_s1 + $0x318] sm:$0xff]  ;;  %v178_v59 = vld [vmem:[%s5061_s1 + $0x310] sm:$0xff]  ;;  %v177_v61 = vld [vmem:[%s5061_s1 + $0x308] sm:$0xff] }
  0x2c   :  { %604 = vmatprep.subr.mxu1 %v199_v17  ;;  %528 = vmatpush2.msra.mxu0 %v134_v18  ;;  %v112_v62 = vld [vmem:[%s5061_s1 + $0x100] sm:$0xff]  ;;  %v55_v63 = vld [vmem:[%s5079_s22 + $0x8] sm:$0xff]  ;;  %v57_v1 = vld [vmem:[%s5079_s22 + $0x18] sm:$0xff] }
  0x2d   :  { %605 = vmatpush2.msra.mxu1 %v198_v19  ;;  %529 = vmatprep.subr.mxu0 %v133_v20  ;;  %v176_v0 = vld [vmem:[%s5061_s1 + $0x300] sm:$0xff]  ;;  %v56_v3 = vld [vmem:[%s5079_s22 + $0x10] sm:$0xff]  ;;  %v239_v4 = vld [vmem:[%s5061_s1 + $0x4f8] sm:$0xff] }
  0x2e   :  { %606 = vmatprep.subr.mxu1 %v197_v21  ;;  %530 = vmatpush2.msra.mxu0 %v132_v22  ;;  %v54_v2 = vld [vmem:[%s5079_s22] sm:$0xff]  ;;  %v303_v5 = vld [vmem:[%s5061_s1 + $0x6f8] sm:$0xff]  ;;  %v238_v6 = vld [vmem:[%s5061_s1 + $0x4f0] sm:$0xff] }
  0x2f   :  { %607 = vmatpush2.msra.mxu1 %v196_v23  ;;  %531 = vmatprep.subr.mxu0 %v131_v24  ;;  %v302_v7 = vld [vmem:[%s5061_s1 + $0x6f0] sm:$0xff]  ;;  %v237_v8 = vld [vmem:[%s5061_s1 + $0x4e8] sm:$0xff]  ;;  %v236_v10 = vld [vmem:[%s5061_s1 + $0x4e0] sm:$0xff] }
  0x30   :  { %608 = vmatprep.subr.mxu1 %v195_v25  ;;  %532 = vmatpush2.msra.mxu0 %v130_v26  ;;  %v301_v9 = vld [vmem:[%s5061_s1 + $0x6e8] sm:$0xff]  ;;  %v300_v11 = vld [vmem:[%s5061_s1 + $0x6e0] sm:$0xff]  ;;  %v235_v12 = vld [vmem:[%s5061_s1 + $0x4d8] sm:$0xff] }
  0x31   :  { %609 = vmatpush2.msra.mxu1 %v194_v27  ;;  %533 = vmatprep.subr.mxu0 %v129_v28  ;;  %v299_v13 = vld [vmem:[%s5061_s1 + $0x6d8] sm:$0xff]  ;;  %v234_v14 = vld [vmem:[%s5061_s1 + $0x4d0] sm:$0xff]  ;;  %v233_v16 = vld [vmem:[%s5061_s1 + $0x4c8] sm:$0xff] }
  0x32   :  { %610 = vmatprep.subr.mxu1 %v193_v29  ;;  %534 = vmatpush2.msra.mxu0 %v128_v30  ;;  %v298_v15 = vld [vmem:[%s5061_s1 + $0x6d0] sm:$0xff]  ;;  %v297_v17 = vld [vmem:[%s5061_s1 + $0x6c8] sm:$0xff]  ;;  %v232_v18 = vld [vmem:[%s5061_s1 + $0x4c0] sm:$0xff] }
  0x33   :  { %611 = vmatpush2.msra.mxu1 %v192_v31  ;;  %535 = vmatprep.subr.mxu0 %v127_v32  ;;  %v296_v19 = vld [vmem:[%s5061_s1 + $0x6c0] sm:$0xff]  ;;  %v231_v20 = vld [vmem:[%s5061_s1 + $0x4b8] sm:$0xff]  ;;  %v230_v22 = vld [vmem:[%s5061_s1 + $0x4b0] sm:$0xff] }
  0x34   :  { %612 = vmatprep.subr.mxu1 %v191_v33  ;;  %536 = vmatpush2.msra.mxu0 %v126_v34  ;;  %v295_v21 = vld [vmem:[%s5061_s1 + $0x6b8] sm:$0xff]  ;;  %v294_v23 = vld [vmem:[%s5061_s1 + $0x6b0] sm:$0xff]  ;;  %v229_v24 = vld [vmem:[%s5061_s1 + $0x4a8] sm:$0xff] }
  0x35   :  { %613 = vmatpush2.msra.mxu1 %v190_v35  ;;  %537 = vmatprep.subr.mxu0 %v125_v36  ;;  %v293_v25 = vld [vmem:[%s5061_s1 + $0x6a8] sm:$0xff]  ;;  %v228_v26 = vld [vmem:[%s5061_s1 + $0x4a0] sm:$0xff]  ;;  %v227_v28 = vld [vmem:[%s5061_s1 + $0x498] sm:$0xff] }
  0x36   :  { %614 = vmatprep.subr.mxu1 %v189_v37  ;;  %538 = vmatpush2.msra.mxu0 %v124_v38  ;;  %v292_v27 = vld [vmem:[%s5061_s1 + $0x6a0] sm:$0xff]  ;;  %v291_v29 = vld [vmem:[%s5061_s1 + $0x698] sm:$0xff]  ;;  %v226_v30 = vld [vmem:[%s5061_s1 + $0x490] sm:$0xff] }
  0x37   :  { %615 = vmatpush2.msra.mxu1 %v188_v39  ;;  %539 = vmatprep.subr.mxu0 %v123_v40  ;;  %v290_v31 = vld [vmem:[%s5061_s1 + $0x690] sm:$0xff]  ;;  %v225_v32 = vld [vmem:[%s5061_s1 + $0x488] sm:$0xff]  ;;  %v224_v34 = vld [vmem:[%s5061_s1 + $0x480] sm:$0xff] }
  0x38   :  { %616 = vmatprep.subr.mxu1 %v187_v41  ;;  %540 = vmatpush2.msra.mxu0 %v122_v42  ;;  %v289_v33 = vld [vmem:[%s5061_s1 + $0x688] sm:$0xff]  ;;  %v288_v35 = vld [vmem:[%s5061_s1 + $0x680] sm:$0xff]  ;;  %v223_v36 = vld [vmem:[%s5061_s1 + $0x478] sm:$0xff] }
  0x39   :  { %617 = vmatpush2.msra.mxu1 %v186_v43  ;;  %541 = vmatprep.subr.mxu0 %v121_v44  ;;  %v287_v37 = vld [vmem:[%s5061_s1 + $0x678] sm:$0xff]  ;;  %v222_v38 = vld [vmem:[%s5061_s1 + $0x470] sm:$0xff]  ;;  %v221_v40 = vld [vmem:[%s5061_s1 + $0x468] sm:$0xff] }
  0x3a   :  { %618 = vmatprep.subr.mxu1 %v185_v45  ;;  %542 = vmatpush2.msra.mxu0 %v120_v46  ;;  %v286_v39 = vld [vmem:[%s5061_s1 + $0x670] sm:$0xff]  ;;  %v285_v41 = vld [vmem:[%s5061_s1 + $0x668] sm:$0xff]  ;;  %v220_v42 = vld [vmem:[%s5061_s1 + $0x460] sm:$0xff] }
  0x3b   :  { %619 = vmatpush2.msra.mxu1 %v184_v47  ;;  %543 = vmatprep.subr.mxu0 %v119_v48  ;;  %v284_v43 = vld [vmem:[%s5061_s1 + $0x660] sm:$0xff]  ;;  %v219_v44 = vld [vmem:[%s5061_s1 + $0x458] sm:$0xff]  ;;  %v218_v46 = vld [vmem:[%s5061_s1 + $0x450] sm:$0xff] }
  0x3c   :  { %620 = vmatprep.subr.mxu1 %v183_v49  ;;  %544 = vmatpush2.msra.mxu0 %v118_v50  ;;  %v283_v45 = vld [vmem:[%s5061_s1 + $0x658] sm:$0xff]  ;;  %v282_v47 = vld [vmem:[%s5061_s1 + $0x650] sm:$0xff]  ;;  %v217_v48 = vld [vmem:[%s5061_s1 + $0x448] sm:$0xff] }
  0x3d   :  { %621 = vmatpush2.msra.mxu1 %v182_v51  ;;  %545 = vmatprep.subr.mxu0 %v117_v52  ;;  %v281_v49 = vld [vmem:[%s5061_s1 + $0x648] sm:$0xff]  ;;  %v216_v50 = vld [vmem:[%s5061_s1 + $0x440] sm:$0xff]  ;;  %v215_v52 = vld [vmem:[%s5061_s1 + $0x438] sm:$0xff] }
  0x3e   :  { %622 = vmatprep.subr.mxu1 %v181_v53  ;;  %546 = vmatpush2.msra.mxu0 %v116_v54  ;;  %v280_v51 = vld [vmem:[%s5061_s1 + $0x640] sm:$0xff]  ;;  %v279_v53 = vld [vmem:[%s5061_s1 + $0x638] sm:$0xff]  ;;  %v214_v54 = vld [vmem:[%s5061_s1 + $0x430] sm:$0xff] }
  0x3f   :  { %623 = vmatpush2.msra.mxu1 %v180_v55  ;;  %547 = vmatprep.subr.mxu0 %v115_v56  ;;  %v278_v55 = vld [vmem:[%s5061_s1 + $0x630] sm:$0xff]  ;;  %v213_v56 = vld [vmem:[%s5061_s1 + $0x428] sm:$0xff] }
  0x40   :  { %624 = vmatprep.subr.mxu1 %v179_v57  ;;  %548 = vmatpush2.msra.mxu0 %v114_v58  ;;  %v277_v57 = vld [vmem:[%s5061_s1 + $0x628] sm:$0xff]  ;;  %v212_v58 = vld [vmem:[%s5061_s1 + $0x420] sm:$0xff] }
  0x41   :  { %625 = vmatpush2.msra.mxu1 %v178_v59  ;;  %549 = vmatprep.subr.mxu0 %v113_v60  ;;  %v276_v59 = vld [vmem:[%s5061_s1 + $0x620] sm:$0xff]  ;;  %v211_v60 = vld [vmem:[%s5061_s1 + $0x418] sm:$0xff] }
  0x42   :  { %626 = vmatprep.subr.mxu1 %v177_v61  ;;  %550 = vmatpush2.msra.mxu0 %v112_v62  ;;  %v275_v61 = vld [vmem:[%s5061_s1 + $0x618] sm:$0xff]  ;;  %v210_v62 = vld [vmem:[%s5061_s1 + $0x410] sm:$0xff] }
  0x43   :  { %551 = vmatprep.mubr.f32.mxu0 %v55_v63  ;;  %627 = vmatpush2.msra.mxu1 %v176_v0  ;;  %v274_v63 = vld [vmem:[%s5061_s1 + $0x610] sm:$0xff]  ;;  %v209_v0 = vld [vmem:[%s5061_s1 + $0x408] sm:$0xff] }
  0x44   :  { %628 = vmatprep.mubr.f32.mxu1 %v57_v1  ;;  %552 = vmatmul.mubr.f32.vlgmr.msra.gmra.mxu0 %v54_v2  ;;  %v273_v1 = vld [vmem:[%s5061_s1 + $0x608] sm:$0xff]  ;;  %v208_v2 = vld [vmem:[%s5061_s1 + $0x400] sm:$0xff] }
  0x45   :  { %629 = vmatmul.mubr.f32.vlgmr.msra.gmra.mxu1 %v56_v3  ;;  %641 = vmatprep.subr.mxu0 %v239_v4  ;;  %v272_v3 = vld [vmem:[%s5061_s1 + $0x600] sm:$0xff]  ;;  %v271_v4 = vld [vmem:[%s5061_s1 + $0x5f8] sm:$0xff] }
  0x46   :  { %718 = vmatprep.subr.mxu1 %v303_v5  ;;  %642 = vmatpush1.msra.mxu0 %v238_v6  ;;  %v335_v5 = vld [vmem:[%s5061_s1 + $0x7f8] sm:$0xff]  ;;  %v270_v6 = vld [vmem:[%s5061_s1 + $0x5f0] sm:$0xff] }
  0x47   :  { %719 = vmatpush1.msra.mxu1 %v302_v7  ;;  %643 = vmatprep.subr.mxu0 %v237_v8  ;;  %v334_v7 = vld [vmem:[%s5061_s1 + $0x7f0] sm:$0xff]  ;;  %v269_v8 = vld [vmem:[%s5061_s1 + $0x5e8] sm:$0xff] }
  0x48   :  { %720 = vmatprep.subr.mxu1 %v301_v9  ;;  %644 = vmatpush1.msra.mxu0 %v236_v10  ;;  %v333_v9 = vld [vmem:[%s5061_s1 + $0x7e8] sm:$0xff]  ;;  %v268_v10 = vld [vmem:[%s5061_s1 + $0x5e0] sm:$0xff] }
  0x49   :  { %721 = vmatpush1.msra.mxu1 %v300_v11  ;;  %645 = vmatprep.subr.mxu0 %v235_v12  ;;  %v332_v11 = vld [vmem:[%s5061_s1 + $0x7e0] sm:$0xff]  ;;  %v267_v12 = vld [vmem:[%s5061_s1 + $0x5d8] sm:$0xff] }
  0x4a   :  { %722 = vmatprep.subr.mxu1 %v299_v13  ;;  %646 = vmatpush1.msra.mxu0 %v234_v14  ;;  %v331_v13 = vld [vmem:[%s5061_s1 + $0x7d8] sm:$0xff]  ;;  %v266_v14 = vld [vmem:[%s5061_s1 + $0x5d0] sm:$0xff] }
  0x4b   :  { %723 = vmatpush1.msra.mxu1 %v298_v15  ;;  %647 = vmatprep.subr.mxu0 %v233_v16  ;;  %v330_v15 = vld [vmem:[%s5061_s1 + $0x7d0] sm:$0xff]  ;;  %v265_v16 = vld [vmem:[%s5061_s1 + $0x5c8] sm:$0xff] }
  0x4c   :  { %724 = vmatprep.subr.mxu1 %v297_v17  ;;  %648 = vmatpush1.msra.mxu0 %v232_v18  ;;  %v329_v17 = vld [vmem:[%s5061_s1 + $0x7c8] sm:$0xff]  ;;  %v264_v18 = vld [vmem:[%s5061_s1 + $0x5c0] sm:$0xff] }
  0x4d   :  { %725 = vmatpush1.msra.mxu1 %v296_v19  ;;  %649 = vmatprep.subr.mxu0 %v231_v20  ;;  %v328_v19 = vld [vmem:[%s5061_s1 + $0x7c0] sm:$0xff]  ;;  %v263_v20 = vld [vmem:[%s5061_s1 + $0x5b8] sm:$0xff] }
  0x4e   :  { %726 = vmatprep.subr.mxu1 %v295_v21  ;;  %650 = vmatpush1.msra.mxu0 %v230_v22  ;;  %v327_v21 = vld [vmem:[%s5061_s1 + $0x7b8] sm:$0xff]  ;;  %v262_v22 = vld [vmem:[%s5061_s1 + $0x5b0] sm:$0xff] }
  0x4f   :  { %727 = vmatpush1.msra.mxu1 %v294_v23  ;;  %651 = vmatprep.subr.mxu0 %v229_v24  ;;  %v326_v23 = vld [vmem:[%s5061_s1 + $0x7b0] sm:$0xff]  ;;  %v261_v24 = vld [vmem:[%s5061_s1 + $0x5a8] sm:$0xff] }
  0x50   :  { %728 = vmatprep.subr.mxu1 %v293_v25  ;;  %652 = vmatpush1.msra.mxu0 %v228_v26  ;;  %v325_v25 = vld [vmem:[%s5061_s1 + $0x7a8] sm:$0xff]  ;;  %v260_v26 = vld [vmem:[%s5061_s1 + $0x5a0] sm:$0xff] }
  0x51   :  { %729 = vmatpush1.msra.mxu1 %v292_v27  ;;  %653 = vmatprep.subr.mxu0 %v227_v28  ;;  %v324_v27 = vld [vmem:[%s5061_s1 + $0x7a0] sm:$0xff]  ;;  %v259_v28 = vld [vmem:[%s5061_s1 + $0x598] sm:$0xff] }
  0x52   :  { %730 = vmatprep.subr.mxu1 %v291_v29  ;;  %654 = vmatpush1.msra.mxu0 %v226_v30  ;;  %v323_v29 = vld [vmem:[%s5061_s1 + $0x798] sm:$0xff]  ;;  %v258_v30 = vld [vmem:[%s5061_s1 + $0x590] sm:$0xff] }
  0x53   :  { %731 = vmatpush1.msra.mxu1 %v290_v31  ;;  %655 = vmatprep.subr.mxu0 %v225_v32  ;;  %v322_v31 = vld [vmem:[%s5061_s1 + $0x790] sm:$0xff]  ;;  %v257_v32 = vld [vmem:[%s5061_s1 + $0x588] sm:$0xff] }
  0x54   :  { %732 = vmatprep.subr.mxu1 %v289_v33  ;;  %656 = vmatpush1.msra.mxu0 %v224_v34  ;;  %v321_v33 = vld [vmem:[%s5061_s1 + $0x788] sm:$0xff]  ;;  %v256_v34 = vld [vmem:[%s5061_s1 + $0x580] sm:$0xff] }
  0x55   :  { %733 = vmatpush1.msra.mxu1 %v288_v35  ;;  %657 = vmatprep.subr.mxu0 %v223_v36  ;;  %v320_v35 = vld [vmem:[%s5061_s1 + $0x780] sm:$0xff]  ;;  %v255_v36 = vld [vmem:[%s5061_s1 + $0x578] sm:$0xff] }
  0x56   :  { %734 = vmatprep.subr.mxu1 %v287_v37  ;;  %658 = vmatpush1.msra.mxu0 %v222_v38  ;;  %v319_v37 = vld [vmem:[%s5061_s1 + $0x778] sm:$0xff]  ;;  %v254_v38 = vld [vmem:[%s5061_s1 + $0x570] sm:$0xff] }
  0x57   :  { %735 = vmatpush1.msra.mxu1 %v286_v39  ;;  %659 = vmatprep.subr.mxu0 %v221_v40  ;;  %v318_v39 = vld [vmem:[%s5061_s1 + $0x770] sm:$0xff]  ;;  %v253_v40 = vld [vmem:[%s5061_s1 + $0x568] sm:$0xff] }
  0x58   :  { %736 = vmatprep.subr.mxu1 %v285_v41  ;;  %660 = vmatpush1.msra.mxu0 %v220_v42  ;;  %v317_v41 = vld [vmem:[%s5061_s1 + $0x768] sm:$0xff]  ;;  %v252_v42 = vld [vmem:[%s5061_s1 + $0x560] sm:$0xff] }
  0x59   :  { %737 = vmatpush1.msra.mxu1 %v284_v43  ;;  %661 = vmatprep.subr.mxu0 %v219_v44  ;;  %v316_v43 = vld [vmem:[%s5061_s1 + $0x760] sm:$0xff]  ;;  %v251_v44 = vld [vmem:[%s5061_s1 + $0x558] sm:$0xff] }
  0x5a   :  { %738 = vmatprep.subr.mxu1 %v283_v45  ;;  %662 = vmatpush1.msra.mxu0 %v218_v46  ;;  %v315_v45 = vld [vmem:[%s5061_s1 + $0x758] sm:$0xff]  ;;  %v250_v46 = vld [vmem:[%s5061_s1 + $0x550] sm:$0xff] }
  0x5b   :  { %739 = vmatpush1.msra.mxu1 %v282_v47  ;;  %663 = vmatprep.subr.mxu0 %v217_v48  ;;  %v314_v47 = vld [vmem:[%s5061_s1 + $0x750] sm:$0xff]  ;;  %v249_v48 = vld [vmem:[%s5061_s1 + $0x548] sm:$0xff] }
  0x5c   :  { %740 = vmatprep.subr.mxu1 %v281_v49  ;;  %664 = vmatpush1.msra.mxu0 %v216_v50  ;;  %v313_v49 = vld [vmem:[%s5061_s1 + $0x748] sm:$0xff]  ;;  %v248_v50 = vld [vmem:[%s5061_s1 + $0x540] sm:$0xff] }
  0x5d   :  { %741 = vmatpush1.msra.mxu1 %v280_v51  ;;  %665 = vmatprep.subr.mxu0 %v215_v52  ;;  %v312_v51 = vld [vmem:[%s5061_s1 + $0x740] sm:$0xff]  ;;  %v247_v52 = vld [vmem:[%s5061_s1 + $0x538] sm:$0xff] }
  0x5e   :  { %742 = vmatprep.subr.mxu1 %v279_v53  ;;  %666 = vmatpush1.msra.mxu0 %v214_v54  ;;  %v68_v53 = vld [vmem:[%s5079_s22 + $0x70] sm:$0x3] }
  0x5f   :  { %743 = vmatpush1.msra.mxu1 %v278_v55  ;;  %667 = vmatprep.subr.mxu0 %v213_v56  ;;  %v246_v54 = vld [vmem:[%s5061_s1 + $0x530] sm:$0xff]  ;;  %v70_v55 = vld [vmem:[%s5079_s22 + $0x80] sm:$0x3]  ;;  %v245_v56 = vld [vmem:[%s5061_s1 + $0x528] sm:$0xff] }
  0x60   :  { %744 = vmatprep.subr.mxu1 %v277_v57  ;;  %668 = vmatpush1.msra.mxu0 %v212_v58  ;;  %v311_v57 = vld [vmem:[%s5061_s1 + $0x738] sm:$0xff]  ;;  %v67_v58 = vld [vmem:[%s5079_s22 + $0x68] sm:$0x3] }
  0x61   :  { %745 = vmatpush1.msra.mxu1 %v276_v59  ;;  %669 = vmatprep.subr.mxu0 %v211_v60  ;;  %v69_v59 = vld [vmem:[%s5079_s22 + $0x78] sm:$0x3]  ;;  %v244_v60 = vld [vmem:[%s5061_s1 + $0x520] sm:$0xff] }
  0x62   :  { %746 = vmatprep.subr.mxu1 %v275_v61  ;;  %670 = vmatpush1.msra.mxu0 %v210_v62  ;;  %v310_v61 = vld [vmem:[%s5061_s1 + $0x730] sm:$0xff]  ;;  %v243_v62 = vld [vmem:[%s5061_s1 + $0x518] sm:$0xff] }
  0x63   :  { %747 = vmatpush1.msra.mxu1 %v274_v63  ;;  %671 = vmatprep.subr.mxu0 %v209_v0  ;;  %v309_v63 = vld [vmem:[%s5061_s1 + $0x728] sm:$0xff]  ;;  %v242_v0 = vld [vmem:[%s5061_s1 + $0x510] sm:$0xff] }
  0x64   :  { %748 = vmatprep.subr.mxu1 %v273_v1  ;;  %672 = vmatpush1.msra.mxu0 %v208_v2  ;;  %v308_v1 = vld [vmem:[%s5061_s1 + $0x720] sm:$0xff]  ;;  %v241_v2 = vld [vmem:[%s5061_s1 + $0x508] sm:$0xff] }
  0x65   :  { %749 = vmatpush1.msra.mxu1 %v272_v3  ;;  %673 = vmatprep.subr.mxu0 %v271_v4  ;;  %v307_v3 = vld [vmem:[%s5061_s1 + $0x718] sm:$0xff]  ;;  %v240_v4 = vld [vmem:[%s5061_s1 + $0x500] sm:$0xff] }
  0x66   :  { %750 = vmatprep.subr.mxu1 %v335_v5  ;;  %674 = vmatpush2.msra.mxu0 %v270_v6  ;;  %v59_v5 = vld [vmem:[%s5079_s22 + $0x28] sm:$0xff]  ;;  %v306_v6 = vld [vmem:[%s5061_s1 + $0x710] sm:$0xff] }
  0x67   :  { %751 = vmatpush2.msra.mxu1 %v334_v7  ;;  %675 = vmatprep.subr.mxu0 %v269_v8  ;;  %v58_v7 = vld [vmem:[%s5079_s22 + $0x20] sm:$0xff]  ;;  %v305_v8 = vld [vmem:[%s5061_s1 + $0x708] sm:$0xff] }
  0x68   :  { %752 = vmatprep.subr.mxu1 %v333_v9  ;;  %676 = vmatpush2.msra.mxu0 %v268_v10  ;;  %v367_v9 = vld [vmem:[%s5061_s1 + $0x8f8] sm:$0xff]  ;;  %v304_v10 = vld [vmem:[%s5061_s1 + $0x700] sm:$0xff] }
  0x69   :  { %753 = vmatpush2.msra.mxu1 %v332_v11  ;;  %677 = vmatprep.subr.mxu0 %v267_v12  ;;  %v61_v11 = vld [vmem:[%s5079_s22 + $0x38] sm:$0xff]  ;;  %v366_v12 = vld [vmem:[%s5061_s1 + $0x8f0] sm:$0xff] }
  0x6a   :  { %754 = vmatprep.subr.mxu1 %v331_v13  ;;  %678 = vmatpush2.msra.mxu0 %v266_v14  ;;  %v60_v13 = vld [vmem:[%s5079_s22 + $0x30] sm:$0xff]  ;;  %v365_v14 = vld [vmem:[%s5061_s1 + $0x8e8] sm:$0xff] }
  0x6b   :  { %755 = vmatpush2.msra.mxu1 %v330_v15  ;;  %679 = vmatprep.subr.mxu0 %v265_v16  ;;  %v431_v15 = vld [vmem:[%s5061_s1 + $0xaf8] sm:$0xff]  ;;  %v72_v16 = vld [vmem:[%s5079_s22 + $0x90] sm:$0x3] }
  0x6c   :  { %756 = vmatprep.subr.mxu1 %v329_v17  ;;  %680 = vmatpush2.msra.mxu0 %v264_v18  ;;  %v364_v17 = vld [vmem:[%s5061_s1 + $0x8e0] sm:$0xff]  ;;  %v430_v18 = vld [vmem:[%s5061_s1 + $0xaf0] sm:$0xff] }
  0x6d   :  { %757 = vmatpush2.msra.mxu1 %v328_v19  ;;  %681 = vmatprep.subr.mxu0 %v263_v20  ;;  %v71_v19 = vld [vmem:[%s5079_s22 + $0x88] sm:$0x3]  ;;  %v363_v20 = vld [vmem:[%s5061_s1 + $0x8d8] sm:$0xff] }
  0x6e   :  { %758 = vmatprep.subr.mxu1 %v327_v21  ;;  %682 = vmatpush2.msra.mxu0 %v262_v22  ;;  %v429_v21 = vld [vmem:[%s5061_s1 + $0xae8] sm:$0xff]  ;;  %v74_v22 = vld [vmem:[%s5079_s22 + $0xa0] sm:$0x3] }
  0x6f   :  { %759 = vmatpush2.msra.mxu1 %v326_v23  ;;  %683 = vmatprep.subr.mxu0 %v261_v24  ;;  %v362_v23 = vld [vmem:[%s5061_s1 + $0x8d0] sm:$0xff]  ;;  %v428_v24 = vld [vmem:[%s5061_s1 + $0xae0] sm:$0xff] }
  0x70   :  { %760 = vmatprep.subr.mxu1 %v325_v25  ;;  %684 = vmatpush2.msra.mxu0 %v260_v26  ;;  %v361_v25 = vld [vmem:[%s5061_s1 + $0x8c8] sm:$0xff]  ;;  %v73_v26 = vld [vmem:[%s5079_s22 + $0x98] sm:$0x3] }
  0x71   :  { %761 = vmatpush2.msra.mxu1 %v324_v27  ;;  %685 = vmatprep.subr.mxu0 %v259_v28  ;;  %v427_v27 = vld [vmem:[%s5061_s1 + $0xad8] sm:$0xff]  ;;  %v360_v28 = vld [vmem:[%s5061_s1 + $0x8c0] sm:$0xff] }
  0x72   :  { %762 = vmatprep.subr.mxu1 %v323_v29  ;;  %686 = vmatpush2.msra.mxu0 %v258_v30  ;;  %v426_v29 = vld [vmem:[%s5061_s1 + $0xad0] sm:$0xff]  ;;  %v359_v30 = vld [vmem:[%s5061_s1 + $0x8b8] sm:$0xff] }
  0x73   :  { %763 = vmatpush2.msra.mxu1 %v322_v31  ;;  %687 = vmatprep.subr.mxu0 %v257_v32  ;;  %v425_v31 = vld [vmem:[%s5061_s1 + $0xac8] sm:$0xff]  ;;  %v358_v32 = vld [vmem:[%s5061_s1 + $0x8b0] sm:$0xff] }
  0x74   :  { %764 = vmatprep.subr.mxu1 %v321_v33  ;;  %688 = vmatpush2.msra.mxu0 %v256_v34  ;;  %v424_v33 = vld [vmem:[%s5061_s1 + $0xac0] sm:$0xff] }
  0x75   :  { %765 = vmatpush2.msra.mxu1 %v320_v35  ;;  %689 = vmatprep.subr.mxu0 %v255_v36 }
  0x76   :  { %766 = vmatprep.subr.mxu1 %v319_v37  ;;  %690 = vmatpush2.msra.mxu0 %v254_v38 }
  0x77   :  { %767 = vmatpush2.msra.mxu1 %v318_v39  ;;  %691 = vmatprep.subr.mxu0 %v253_v40 }
  0x78   :  { %768 = vmatprep.subr.mxu1 %v317_v41  ;;  %692 = vmatpush2.msra.mxu0 %v252_v42 }
  0x79   :  { %769 = vmatpush2.msra.mxu1 %v316_v43  ;;  %693 = vmatprep.subr.mxu0 %v251_v44 }
  0x7a   :  { %770 = vmatprep.subr.mxu1 %v315_v45  ;;  %694 = vmatpush2.msra.mxu0 %v250_v46 }
  0x7b   :  { %771 = vmatpush2.msra.mxu1 %v314_v47  ;;  %695 = vmatprep.subr.mxu0 %v249_v48 }
  0x7c   :  { %772 = vmatprep.subr.mxu1 %v313_v49  ;;  %696 = vmatpush2.msra.mxu0 %v248_v50 }
  0x7d   :  { %773 = vmatpush2.msra.mxu1 %v312_v51  ;;  %697 = vmatprep.subr.mxu0 %v247_v52 }
  0x7e   :  { %557 = vmatprep.mubr.f32.mxu0 %v68_v53  ;;  %698 = vmatpush2.msra.mxu0 %v246_v54 }
  0x7f   :  { %634 = vmatprep.mubr.f32.mxu1 %v70_v55  ;;  %699 = vmatprep.subr.mxu0 %v245_v56 }
  0x80   :  { %774 = vmatprep.subr.mxu1 %v311_v57  ;;  %558 = vmatmul.mubr.f32.gmra.mxu0 %v67_v58 }
  0x81   :  { %635 = vmatmul.mubr.f32.gmra.mxu1 %v69_v59  ;;  %700 = vmatpush2.msra.mxu0 %v244_v60 }
  0x82   :  { %775 = vmatpush2.msra.mxu1 %v310_v61  ;;  %701 = vmatprep.subr.mxu0 %v243_v62 }
  0x83   :  { %776 = vmatprep.subr.mxu1 %v309_v63  ;;  %702 = vmatpush2.msra.mxu0 %v242_v0 }
  0x84   :  { %777 = vmatpush2.msra.mxu1 %v308_v1  ;;  %703 = vmatprep.subr.mxu0 %v241_v2 }
  0x85   :  { %778 = vmatprep.subr.mxu1 %v307_v3  ;;  %704 = vmatpush2.msra.mxu0 %v240_v4 }
  0x86   :  { %705 = vmatprep.mubr.f32.mxu0 %v59_v5  ;;  %779 = vmatpush2.msra.mxu1 %v306_v6 }
  0x87   :  { %706 = vmatmul.mubr.f32.vlgmr.msra.gmra.mxu0 %v58_v7  ;;  %780 = vmatprep.subr.mxu1 %v305_v8 }
  0x88   :  { %795 = vmatprep.subr.mxu0 %v367_v9  ;;  %781 = vmatpush2.msra.mxu1 %v304_v10 }
  0x89   :  { %782 = vmatprep.mubr.f32.mxu1 %v61_v11  ;;  %796 = vmatpush1.msra.mxu0 %v366_v12 }
  0x8a   :  { %783 = vmatmul.mubr.f32.vlgmr.msra.gmra.mxu1 %v60_v13  ;;  %797 = vmatprep.subr.mxu0 %v365_v14 }
  0x8b   :  { %872 = vmatprep.subr.mxu1 %v431_v15  ;;  %711 = vmatprep.mubr.f32.mxu0 %v72_v16 }
  0x8c   :  { %798 = vmatpush1.msra.mxu0 %v364_v17  ;;  %873 = vmatpush1.msra.mxu1 %v430_v18 }
  0x8d   :  { %712 = vmatmul.mubr.f32.gmra.mxu0 %v71_v19  ;;  %799 = vmatprep.subr.mxu0 %v363_v20 }
  0x8e   :  { %874 = vmatprep.subr.mxu1 %v429_v21  ;;  %788 = vmatprep.mubr.f32.mxu1 %v74_v22 }
  0x8f   :  { %800 = vmatpush1.msra.mxu0 %v362_v23  ;;  %875 = vmatpush1.msra.mxu1 %v428_v24 }
  0x90   :  { %801 = vmatprep.subr.mxu0 %v361_v25  ;;  %789 = vmatmul.mubr.f32.gmra.mxu1 %v73_v26 }
  0x91   :  { %876 = vmatprep.subr.mxu1 %v427_v27 }
  0x92   :  { %21 = vsyncpa [#allocation3], 0  ;;  %802 = vmatpush1.msra.mxu0 %v360_v28  ;;  %877 = vmatpush1.msra.mxu1 %v426_v29  ;;  %v357_v34 = vld [vmem:[%s5061_s1 + $0x8a8] sm:$0xff]  ;;  %v423_v35 = vld [vmem:[%s5061_s1 + $0xab8] sm:$0xff]  ;;  %vm480_vm0 = vcmask 523264   ;;  %vm1026_vm1 = vcmask 1041408  }
  0x93   :  { %803 = vmatprep.subr.mxu0 %v359_v30  ;;  %878 = vmatprep.subr.mxu1 %v425_v31  ;;  %v356_v36 = vld [vmem:[%s5061_s1 + $0x8a0] sm:$0xff]  ;;  %v422_v37 = vld [vmem:[%s5061_s1 + $0xab0] sm:$0xff]  ;;  %v355_v38 = vld [vmem:[%s5061_s1 + $0x898] sm:$0xff]  ;;  %vm1254_vm2 = vcmask 1043456   ;;  %vm1250_vm3 = vcmask 31744   ;;  %vm2921_vm4 = vmmov 0  }
  0x94   :  { %804 = vmatpush1.msra.mxu0 %v358_v32  ;;  %879 = vmatpush1.msra.mxu1 %v424_v33  ;;  %v421_v39 = vld [vmem:[%s5061_s1 + $0xaa8] sm:$0xff]  ;;  %v354_v40 = vld [vmem:[%s5061_s1 + $0x890] sm:$0xff]  ;;  %v420_v41 = vld [vmem:[%s5061_s1 + $0xaa0] sm:$0xff]  ;;  %vm1956_vm5 = vcmask 517120   ;;  %vm2139_vm6 = vcmask 64512   ;;  %vm2378_vm7 = vcmask 123904  }
  0x95   :  { %805 = vmatprep.subr.mxu0 %v357_v34  ;;  %880 = vmatprep.subr.mxu1 %v423_v35  ;;  %v353_v42 = vld [vmem:[%s5061_s1 + $0x888] sm:$0xff]  ;;  %v419_v43 = vld [vmem:[%s5061_s1 + $0xa98] sm:$0xff]  ;;  %v352_v44 = vld [vmem:[%s5061_s1 + $0x880] sm:$0xff]  ;;  %vm2430_vm8 = vcmask 130048   ;;  %vm2504_vm9 = vcmask 9216  }
  0x96   :  { %806 = vmatpush1.msra.mxu0 %v356_v36  ;;  %881 = vmatpush1.msra.mxu1 %v422_v37  ;;  %v418_v45 = vld [vmem:[%s5061_s1 + $0xa90] sm:$0xff]  ;;  %v351_v46 = vld [vmem:[%s5061_s1 + $0x878] sm:$0xff]  ;;  %v417_v47 = vld [vmem:[%s5061_s1 + $0xa88] sm:$0xff] }
  0x97   :  { %807 = vmatprep.subr.mxu0 %v355_v38  ;;  %882 = vmatprep.subr.mxu1 %v421_v39  ;;  %v350_v48 = vld [vmem:[%s5061_s1 + $0x870] sm:$0xff]  ;;  %v416_v49 = vld [vmem:[%s5061_s1 + $0xa80] sm:$0xff]  ;;  %v349_v50 = vld [vmem:[%s5061_s1 + $0x868] sm:$0xff] }
  0x98   :  { %808 = vmatpush1.msra.mxu0 %v354_v40  ;;  %883 = vmatpush1.msra.mxu1 %v420_v41  ;;  %v415_v51 = vld [vmem:[%s5061_s1 + $0xa78] sm:$0xff]  ;;  %v348_v52 = vld [vmem:[%s5061_s1 + $0x860] sm:$0xff]  ;;  %v414_v53 = vld [vmem:[%s5061_s1 + $0xa70] sm:$0xff] }
  0x99   :  { %809 = vmatprep.subr.mxu0 %v353_v42  ;;  %884 = vmatprep.subr.mxu1 %v419_v43  ;;  %v347_v54 = vld [vmem:[%s5061_s1 + $0x858] sm:$0xff]  ;;  %v413_v55 = vld [vmem:[%s5061_s1 + $0xa68] sm:$0xff]  ;;  %v346_v56 = vld [vmem:[%s5061_s1 + $0x850] sm:$0xff] }
  0x9a   :  { %810 = vmatpush1.msra.mxu0 %v352_v44  ;;  %885 = vmatpush1.msra.mxu1 %v418_v45  ;;  %v412_v57 = vld [vmem:[%s5061_s1 + $0xa60] sm:$0xff]  ;;  %v345_v58 = vld [vmem:[%s5061_s1 + $0x848] sm:$0xff]  ;;  %v411_v59 = vld [vmem:[%s5061_s1 + $0xa58] sm:$0xff] }
  0x9b   :  { %811 = vmatprep.subr.mxu0 %v351_v46  ;;  %886 = vmatprep.subr.mxu1 %v417_v47  ;;  %v344_v60 = vld [vmem:[%s5061_s1 + $0x840] sm:$0xff]  ;;  %v410_v61 = vld [vmem:[%s5061_s1 + $0xa50] sm:$0xff]  ;;  %v343_v62 = vld [vmem:[%s5061_s1 + $0x838] sm:$0xff] }
  0x9c   :  { %812 = vmatpush1.msra.mxu0 %v350_v48  ;;  %887 = vmatpush1.msra.mxu1 %v416_v49  ;;  %v409_v63 = vld [vmem:[%s5061_s1 + $0xa48] sm:$0xff]  ;;  %v342_v0 = vld [vmem:[%s5061_s1 + $0x830] sm:$0xff]  ;;  %v408_v1 = vld [vmem:[%s5061_s1 + $0xa40] sm:$0xff] }
  0x9d   :  { %813 = vmatprep.subr.mxu0 %v349_v50  ;;  %888 = vmatprep.subr.mxu1 %v415_v51  ;;  %v341_v2 = vld [vmem:[%s5061_s1 + $0x828] sm:$0xff]  ;;  %v407_v3 = vld [vmem:[%s5061_s1 + $0xa38] sm:$0xff]  ;;  %v340_v4 = vld [vmem:[%s5061_s1 + $0x820] sm:$0xff] }
  0x9e   :  { %814 = vmatpush1.msra.mxu0 %v348_v52  ;;  %889 = vmatpush1.msra.mxu1 %v414_v53  ;;  %v406_v5 = vld [vmem:[%s5061_s1 + $0xa30] sm:$0xff]  ;;  %v339_v6 = vld [vmem:[%s5061_s1 + $0x818] sm:$0xff]  ;;  %v405_v7 = vld [vmem:[%s5061_s1 + $0xa28] sm:$0xff] }
  0x9f   :  { %815 = vmatprep.subr.mxu0 %v347_v54  ;;  %890 = vmatprep.subr.mxu1 %v413_v55  ;;  %v338_v8 = vld [vmem:[%s5061_s1 + $0x810] sm:$0xff]  ;;  %v404_v9 = vld [vmem:[%s5061_s1 + $0xa20] sm:$0xff]  ;;  %v337_v10 = vld [vmem:[%s5061_s1 + $0x808] sm:$0xff] }
  0xa0   :  { %816 = vmatpush1.msra.mxu0 %v346_v56  ;;  %891 = vmatpush1.msra.mxu1 %v412_v57  ;;  %v403_v11 = vld [vmem:[%s5061_s1 + $0xa18] sm:$0xff]  ;;  %v336_v12 = vld [vmem:[%s5061_s1 + $0x800] sm:$0xff]  ;;  %v402_v13 = vld [vmem:[%s5061_s1 + $0xa10] sm:$0xff] }
  0xa1   :  { %817 = vmatprep.subr.mxu0 %v345_v58  ;;  %892 = vmatprep.subr.mxu1 %v411_v59  ;;  %v399_v14 = vld [vmem:[%s5061_s1 + $0x9f8] sm:$0xff]  ;;  %v401_v15 = vld [vmem:[%s5061_s1 + $0xa08] sm:$0xff]  ;;  %v398_v16 = vld [vmem:[%s5061_s1 + $0x9f0] sm:$0xff] }
  0xa2   :  { %818 = vmatpush1.msra.mxu0 %v344_v60  ;;  %893 = vmatpush1.msra.mxu1 %v410_v61  ;;  %v400_v17 = vld [vmem:[%s5061_s1 + $0xa00] sm:$0xff]  ;;  %v397_v18 = vld [vmem:[%s5061_s1 + $0x9e8] sm:$0xff]  ;;  %v463_v19 = vld [vmem:[%s5061_s1 + $0xbf8] sm:$0xff] }
  0xa3   :  { %819 = vmatprep.subr.mxu0 %v343_v62  ;;  %894 = vmatprep.subr.mxu1 %v409_v63  ;;  %v396_v20 = vld [vmem:[%s5061_s1 + $0x9e0] sm:$0xff]  ;;  %v462_v21 = vld [vmem:[%s5061_s1 + $0xbf0] sm:$0xff]  ;;  %v395_v22 = vld [vmem:[%s5061_s1 + $0x9d8] sm:$0xff] }
  0xa4   :  { %820 = vmatpush1.msra.mxu0 %v342_v0  ;;  %895 = vmatpush1.msra.mxu1 %v408_v1  ;;  %v461_v23 = vld [vmem:[%s5061_s1 + $0xbe8] sm:$0xff]  ;;  %v394_v24 = vld [vmem:[%s5061_s1 + $0x9d0] sm:$0xff]  ;;  %v460_v25 = vld [vmem:[%s5061_s1 + $0xbe0] sm:$0xff] }
  0xa5   :  { %821 = vmatprep.subr.mxu0 %v341_v2  ;;  %896 = vmatprep.subr.mxu1 %v407_v3  ;;  %v393_v26 = vld [vmem:[%s5061_s1 + $0x9c8] sm:$0xff]  ;;  %v459_v27 = vld [vmem:[%s5061_s1 + $0xbd8] sm:$0xff]  ;;  %v392_v28 = vld [vmem:[%s5061_s1 + $0x9c0] sm:$0xff] }
  0xa6   :  { %822 = vmatpush1.msra.mxu0 %v340_v4  ;;  %897 = vmatpush1.msra.mxu1 %v406_v5  ;;  %v458_v29 = vld [vmem:[%s5061_s1 + $0xbd0] sm:$0xff]  ;;  %v391_v30 = vld [vmem:[%s5061_s1 + $0x9b8] sm:$0xff]  ;;  %v457_v31 = vld [vmem:[%s5061_s1 + $0xbc8] sm:$0xff] }
  0xa7   :  { %823 = vmatprep.subr.mxu0 %v339_v6  ;;  %898 = vmatprep.subr.mxu1 %v405_v7  ;;  %v390_v32 = vld [vmem:[%s5061_s1 + $0x9b0] sm:$0xff]  ;;  %v456_v33 = vld [vmem:[%s5061_s1 + $0xbc0] sm:$0xff]  ;;  %v389_v34 = vld [vmem:[%s5061_s1 + $0x9a8] sm:$0xff] }
  0xa8   :  { %824 = vmatpush1.msra.mxu0 %v338_v8  ;;  %899 = vmatpush1.msra.mxu1 %v404_v9  ;;  %v455_v35 = vld [vmem:[%s5061_s1 + $0xbb8] sm:$0xff]  ;;  %v388_v36 = vld [vmem:[%s5061_s1 + $0x9a0] sm:$0xff]  ;;  %v454_v37 = vld [vmem:[%s5061_s1 + $0xbb0] sm:$0xff] }
  0xa9   :  { %825 = vmatprep.subr.mxu0 %v337_v10  ;;  %900 = vmatprep.subr.mxu1 %v403_v11  ;;  %v387_v38 = vld [vmem:[%s5061_s1 + $0x998] sm:$0xff]  ;;  %v453_v39 = vld [vmem:[%s5061_s1 + $0xba8] sm:$0xff]  ;;  %v386_v40 = vld [vmem:[%s5061_s1 + $0x990] sm:$0xff] }
  0xaa   :  { %826 = vmatpush1.msra.mxu0 %v336_v12  ;;  %901 = vmatpush1.msra.mxu1 %v402_v13  ;;  %v452_v41 = vld [vmem:[%s5061_s1 + $0xba0] sm:$0xff]  ;;  %v385_v42 = vld [vmem:[%s5061_s1 + $0x988] sm:$0xff]  ;;  %v451_v43 = vld [vmem:[%s5061_s1 + $0xb98] sm:$0xff] }
  0xab   :  { %827 = vmatprep.subr.mxu0 %v399_v14  ;;  %902 = vmatprep.subr.mxu1 %v401_v15  ;;  %v384_v44 = vld [vmem:[%s5061_s1 + $0x980] sm:$0xff]  ;;  %v450_v45 = vld [vmem:[%s5061_s1 + $0xb90] sm:$0xff]  ;;  %v383_v46 = vld [vmem:[%s5061_s1 + $0x978] sm:$0xff] }
  0xac   :  { %828 = vmatpush2.msra.mxu0 %v398_v16  ;;  %903 = vmatpush1.msra.mxu1 %v400_v17  ;;  %v449_v47 = vld [vmem:[%s5061_s1 + $0xb88] sm:$0xff]  ;;  %v382_v48 = vld [vmem:[%s5061_s1 + $0x970] sm:$0xff]  ;;  %v448_v49 = vld [vmem:[%s5061_s1 + $0xb80] sm:$0xff] }
  0xad   :  { %829 = vmatprep.subr.mxu0 %v397_v18  ;;  %904 = vmatprep.subr.mxu1 %v463_v19  ;;  %v381_v50 = vld [vmem:[%s5061_s1 + $0x968] sm:$0xff]  ;;  %v447_v51 = vld [vmem:[%s5061_s1 + $0xb78] sm:$0xff]  ;;  %v380_v52 = vld [vmem:[%s5061_s1 + $0x960] sm:$0xff] }
  0xae   :  { %830 = vmatpush2.msra.mxu0 %v396_v20  ;;  %905 = vmatpush2.msra.mxu1 %v462_v21  ;;  %v446_v53 = vld [vmem:[%s5061_s1 + $0xb70] sm:$0xff]  ;;  %v379_v54 = vld [vmem:[%s5061_s1 + $0x958] sm:$0xff]  ;;  %v445_v55 = vld [vmem:[%s5061_s1 + $0xb68] sm:$0xff] }
  0xaf   :  { %831 = vmatprep.subr.mxu0 %v395_v22  ;;  %906 = vmatprep.subr.mxu1 %v461_v23  ;;  %v378_v56 = vld [vmem:[%s5061_s1 + $0x950] sm:$0xff]  ;;  %v444_v57 = vld [vmem:[%s5061_s1 + $0xb60] sm:$0xff]  ;;  %v377_v58 = vld [vmem:[%s5061_s1 + $0x948] sm:$0xff] }
  0xb0   :  { %832 = vmatpush2.msra.mxu0 %v394_v24  ;;  %907 = vmatpush2.msra.mxu1 %v460_v25  ;;  %v443_v59 = vld [vmem:[%s5061_s1 + $0xb58] sm:$0xff]  ;;  %v376_v60 = vld [vmem:[%s5061_s1 + $0x940] sm:$0xff]  ;;  %v442_v61 = vld [vmem:[%s5061_s1 + $0xb50] sm:$0xff] }
  0xb1   :  { %833 = vmatprep.subr.mxu0 %v393_v26  ;;  %908 = vmatprep.subr.mxu1 %v459_v27  ;;  %v375_v62 = vld [vmem:[%s5061_s1 + $0x938] sm:$0xff]  ;;  %v441_v63 = vld [vmem:[%s5061_s1 + $0xb48] sm:$0xff]  ;;  %v374_v0 = vld [vmem:[%s5061_s1 + $0x930] sm:$0xff] }
  0xb2   :  { %834 = vmatpush2.msra.mxu0 %v392_v28  ;;  %909 = vmatpush2.msra.mxu1 %v458_v29  ;;  %v440_v1 = vld [vmem:[%s5061_s1 + $0xb40] sm:$0xff]  ;;  %v373_v2 = vld [vmem:[%s5061_s1 + $0x928] sm:$0xff]  ;;  %v439_v3 = vld [vmem:[%s5061_s1 + $0xb38] sm:$0xff] }
  0xb3   :  { %835 = vmatprep.subr.mxu0 %v391_v30  ;;  %910 = vmatprep.subr.mxu1 %v457_v31  ;;  %v372_v4 = vld [vmem:[%s5061_s1 + $0x920] sm:$0xff]  ;;  %v438_v5 = vld [vmem:[%s5061_s1 + $0xb30] sm:$0xff]  ;;  %v371_v6 = vld [vmem:[%s5061_s1 + $0x918] sm:$0xff] }
  0xb4   :  { %836 = vmatpush2.msra.mxu0 %v390_v32  ;;  %911 = vmatpush2.msra.mxu1 %v456_v33  ;;  %v437_v7 = vld [vmem:[%s5061_s1 + $0xb28] sm:$0xff]  ;;  %v370_v8 = vld [vmem:[%s5061_s1 + $0x910] sm:$0xff]  ;;  %v436_v9 = vld [vmem:[%s5061_s1 + $0xb20] sm:$0xff] }
  0xb5   :  { %837 = vmatprep.subr.mxu0 %v389_v34  ;;  %912 = vmatprep.subr.mxu1 %v455_v35  ;;  %v369_v10 = vld [vmem:[%s5061_s1 + $0x908] sm:$0xff]  ;;  %v435_v11 = vld [vmem:[%s5061_s1 + $0xb18] sm:$0xff]  ;;  %v368_v12 = vld [vmem:[%s5061_s1 + $0x900] sm:$0xff]  ;;  %v2920_v34 = vmov 0.0  }
  0xb6   :  { %838 = vmatpush2.msra.mxu0 %v388_v36  ;;  %913 = vmatpush2.msra.mxu1 %v454_v37  ;;  %v63_v13 = vld [vmem:[%s5079_s22 + $0x48] sm:$0xff]  ;;  %v434_v14 = vld [vmem:[%s5061_s1 + $0xb10] sm:$0xff]  ;;  %v62_v15 = vld [vmem:[%s5079_s22 + $0x40] sm:$0xff] }
  0xb7   :  { %839 = vmatprep.subr.mxu0 %v387_v38  ;;  %914 = vmatprep.subr.mxu1 %v453_v39  ;;  %v433_v16 = vld [vmem:[%s5061_s1 + $0xb08] sm:$0xff]  ;;  %v479_v17 = vld [vmem:[%s5061_s1 + $0xc78] sm:$0xff]  ;;  %v432_v18 = vld [vmem:[%s5061_s1 + $0xb00] sm:$0xff] }
  0xb8   :  { %840 = vmatpush2.msra.mxu0 %v386_v40  ;;  %915 = vmatpush2.msra.mxu1 %v452_v41  ;;  %v65_v19 = vld [vmem:[%s5079_s22 + $0x58] sm:$0xff]  ;;  %v478_v20 = vld [vmem:[%s5061_s1 + $0xc70] sm:$0xff]  ;;  %v477_v22 = vld [vmem:[%s5061_s1 + $0xc68] sm:$0xff] }
  0xb9   :  { %841 = vmatprep.subr.mxu0 %v385_v42  ;;  %916 = vmatprep.subr.mxu1 %v451_v43  ;;  %v64_v21 = vld [vmem:[%s5079_s22 + $0x50] sm:$0xff]  ;;  %v476_v24 = vld [vmem:[%s5061_s1 + $0xc60] sm:$0xff]  ;;  %v75_v26 = vld [vmem:[%s5079_s22 + $0xa8] sm:$0x3] }
  0xba   :  { %842 = vmatpush2.msra.mxu0 %v384_v44  ;;  %917 = vmatpush2.msra.mxu1 %v450_v45  ;;  %v76_v23 = vld [vmem:[%s5079_s22 + $0xb0] sm:$0x3]  ;;  %v78_v25 = vld [vmem:[%s5079_s22 + $0xc0] sm:$0x3]  ;;  %v475_v27 = vld [vmem:[%s5061_s1 + $0xc58] sm:$0xff] }
  0xbb   :  { %843 = vmatprep.subr.mxu0 %v383_v46  ;;  %918 = vmatprep.subr.mxu1 %v449_v47  ;;  %v474_v28 = vld [vmem:[%s5061_s1 + $0xc50] sm:$0xff]  ;;  %v77_v29 = vld [vmem:[%s5079_s22 + $0xb8] sm:$0x3]  ;;  %v473_v30 = vld [vmem:[%s5061_s1 + $0xc48] sm:$0xff] }
  0xbc   :  { %844 = vmatpush2.msra.mxu0 %v382_v48  ;;  %919 = vmatpush2.msra.mxu1 %v448_v49  ;;  %v472_v31 = vld [vmem:[%s5061_s1 + $0xc40] sm:$0xff]  ;;  %v471_v32 = vld [vmem:[%s5061_s1 + $0xc38] sm:$0xff]  ;;  %v470_v33 = vld [vmem:[%s5061_s1 + $0xc30] sm:$0xff] }
  0xbd   :  { %845 = vmatprep.subr.mxu0 %v381_v50  ;;  %920 = vmatprep.subr.mxu1 %v447_v51  ;;  %v469_v35 = vld [vmem:[%s5061_s1 + $0xc28] sm:$0xff]  ;;  %v468_v36 = vld [vmem:[%s5061_s1 + $0xc20] sm:$0xff]  ;;  %v467_v37 = vld [vmem:[%s5061_s1 + $0xc18] sm:$0xff] }
  0xbe   :  { %846 = vmatpush2.msra.mxu0 %v380_v52  ;;  %921 = vmatpush2.msra.mxu1 %v446_v53  ;;  %v466_v38 = vld [vmem:[%s5061_s1 + $0xc10] sm:$0xff]  ;;  %v465_v39 = vld [vmem:[%s5061_s1 + $0xc08] sm:$0xff]  ;;  %v464_v40 = vld [vmem:[%s5061_s1 + $0xc00] sm:$0xff] }
  0xbf   :  { %847 = vmatprep.subr.mxu0 %v379_v54  ;;  %922 = vmatprep.subr.mxu1 %v445_v55  ;;  %v66_v41 = vld [vmem:[%s5079_s22 + $0x60] sm:$0xff]  ;;  %v79_v42 = vld [vmem:[%s5079_s22 + $0xc8] sm:$0x3]  ;;  %v1094_v43 = vld [vmem:[%s5065_s5 + $0xf8] sm:$0xff] }
  0xc0   :  { %848 = vmatpush2.msra.mxu0 %v378_v56  ;;  %923 = vmatpush2.msra.mxu1 %v444_v57  ;;  %v1078_v44 = vld [vmem:[%s5065_s5 + $0x78] sm:$0xff]  ;;  %v1093_v45 = vld [vmem:[%s5065_s5 + $0xf0] sm:$0xff]  ;;  %v1092_v47 = vld [vmem:[%s5065_s5 + $0xe8] sm:$0xff] }
  0xc1   :  { %849 = vmatprep.subr.mxu0 %v377_v58  ;;  %924 = vmatprep.subr.mxu1 %v443_v59  ;;  %v1077_v46 = vld [vmem:[%s5065_s5 + $0x70] sm:$0xff]  ;;  %v1076_v48 = vld [vmem:[%s5065_s5 + $0x68] sm:$0xff]  ;;  %v1091_v49 = vld [vmem:[%s5065_s5 + $0xe0] sm:$0xff] }
  0xc2   :  { %850 = vmatpush2.msra.mxu0 %v376_v60  ;;  %925 = vmatpush2.msra.mxu1 %v442_v61  ;;  %v1075_v50 = vld [vmem:[%s5065_s5 + $0x60] sm:$0xff]  ;;  %v1090_v51 = vld [vmem:[%s5065_s5 + $0xd8] sm:$0xff]  ;;  %v1089_v53 = vld [vmem:[%s5065_s5 + $0xd0] sm:$0xff] }
  0xc3   :  { %851 = vmatprep.subr.mxu0 %v375_v62  ;;  %926 = vmatprep.subr.mxu1 %v441_v63  ;;  %v1074_v52 = vld [vmem:[%s5065_s5 + $0x58] sm:$0xff]  ;;  %v1073_v54 = vld [vmem:[%s5065_s5 + $0x50] sm:$0xff]  ;;  %v1088_v55 = vld [vmem:[%s5065_s5 + $0xc8] sm:$0xff] }
  0xc4   :  { %852 = vmatpush2.msra.mxu0 %v374_v0  ;;  %927 = vmatpush2.msra.mxu1 %v440_v1  ;;  %v1072_v56 = vld [vmem:[%s5065_s5 + $0x48] sm:$0xff]  ;;  %v1087_v57 = vld [vmem:[%s5065_s5 + $0xc0] sm:$0xff]  ;;  %v1086_v59 = vld [vmem:[%s5065_s5 + $0xb8] sm:$0xff] }
  0xc5   :  { %853 = vmatprep.subr.mxu0 %v373_v2  ;;  %928 = vmatprep.subr.mxu1 %v439_v3  ;;  %v1071_v58 = vld [vmem:[%s5065_s5 + $0x40] sm:$0xff]  ;;  %v1070_v60 = vld [vmem:[%s5065_s5 + $0x38] sm:$0xff]  ;;  %v1085_v61 = vld [vmem:[%s5065_s5 + $0xb0] sm:$0xff] }
  0xc6   :  { %854 = vmatpush2.msra.mxu0 %v372_v4  ;;  %929 = vmatpush2.msra.mxu1 %v438_v5  ;;  %v1069_v62 = vld [vmem:[%s5065_s5 + $0x30] sm:$0xff]  ;;  %v1084_v63 = vld [vmem:[%s5065_s5 + $0xa8] sm:$0xff]  ;;  %v1083_v1 = vld [vmem:[%s5065_s5 + $0xa0] sm:$0xff] }
  0xc7   :  { %855 = vmatprep.subr.mxu0 %v371_v6  ;;  %930 = vmatprep.subr.mxu1 %v437_v7  ;;  %v1068_v0 = vld [vmem:[%s5065_s5 + $0x28] sm:$0xff]  ;;  %v1067_v2 = vld [vmem:[%s5065_s5 + $0x20] sm:$0xff]  ;;  %v1082_v3 = vld [vmem:[%s5065_s5 + $0x98] sm:$0xff] }
  0xc8   :  { %856 = vmatpush2.msra.mxu0 %v370_v8  ;;  %931 = vmatpush2.msra.mxu1 %v436_v9  ;;  %v1066_v4 = vld [vmem:[%s5065_s5 + $0x18] sm:$0xff]  ;;  %v1081_v5 = vld [vmem:[%s5065_s5 + $0x90] sm:$0xff]  ;;  %v1080_v7 = vld [vmem:[%s5065_s5 + $0x88] sm:$0xff] }
  0xc9   :  { %857 = vmatprep.subr.mxu0 %v369_v10  ;;  %932 = vmatprep.subr.mxu1 %v435_v11  ;;  %v1065_v6 = vld [vmem:[%s5065_s5 + $0x10] sm:$0xff]  ;;  %v1064_v8 = vld [vmem:[%s5065_s5 + $0x8] sm:$0xff]  ;;  %v1079_v9 = vld [vmem:[%s5065_s5 + $0x80] sm:$0xff] }
  0xca   :  { %858 = vmatpush2.msra.mxu0 %v368_v12  ;;  %859 = vmatprep.mubr.f32.mxu0 %v63_v13  ;;  %v1063_v10 = vld [vmem:[%s5065_s5] sm:$0xff] }
  0xcb   :  { %933 = vmatpush2.msra.mxu1 %v434_v14  ;;  %860 = vmatmul.mubr.f32.vlgmr.msra.gmra.mxu0 %v62_v15 }
  0xcc   :  { %934 = vmatprep.subr.mxu1 %v433_v16  ;;  %965 = vmatprep.subr.mxu0 %v479_v17 }
  0xcd   :  { %935 = vmatpush2.msra.mxu1 %v432_v18  ;;  %936 = vmatprep.mubr.f32.mxu1 %v65_v19 }
  0xce   :  { %966 = vmatpush1.msra.mxu0 %v478_v20  ;;  %937 = vmatmul.mubr.f32.vlgmr.msra.gmra.mxu1 %v64_v21 }
  0xcf   :  { %967 = vmatprep.subr.mxu0 %v477_v22  ;;  %865 = vmatprep.mubr.f32.mxu0 %v76_v23 }
  0xd0   :  { %968 = vmatpush1.msra.mxu0 %v476_v24  ;;  %942 = vmatprep.mubr.f32.mxu1 %v78_v25 }
  0xd1   :  { %866 = vmatmul.mubr.f32.gmra.mxu0 %v75_v26  ;;  %969 = vmatprep.subr.mxu0 %v475_v27 }
  0xd2   :  { %970 = vmatpush1.msra.mxu0 %v474_v28  ;;  %943 = vmatmul.mubr.f32.gmra.mxu1 %v77_v29 }
  0xd3   :  { %971 = vmatprep.subr.mxu0 %v473_v30  ;;  %1013 = vmatprep.mubr.f32.mxu0 %v2920_v34 }
  0xd4   :  { %972 = vmatpush1.msra.mxu0 %v472_v31  ;;  %2535 = vmatprep.subr.mxu1 %v1094_v43 }
  0xd5   :  { %973 = vmatprep.subr.mxu0 %v471_v32  ;;  %2536 = vmatpush3.msra.mxu1 %v1078_v44 }
  0xd6   :  { %974 = vmatpush1.msra.mxu0 %v470_v33  ;;  %2537 = vmatprep.subr.mxu1 %v1093_v45 }
  0xd7   :  { %975 = vmatprep.subr.mxu0 %v469_v35  ;;  %2538 = vmatpush3.msra.mxu1 %v1077_v46 }
  0xd8   :  { %976 = vmatpush1.msra.mxu0 %v468_v36  ;;  %2539 = vmatprep.subr.mxu1 %v1092_v47 }
  0xd9   :  { %977 = vmatprep.subr.mxu0 %v467_v37  ;;  %2540 = vmatpush3.msra.mxu1 %v1076_v48 }
  0xda   :  { %978 = vmatpush1.msra.mxu0 %v466_v38  ;;  %2541 = vmatprep.subr.mxu1 %v1091_v49 }
  0xdb   :  { %979 = vmatprep.subr.mxu0 %v465_v39  ;;  %2542 = vmatpush3.msra.mxu1 %v1075_v50 }
  0xdc   :  { %980 = vmatpush1.msra.mxu0 %v464_v40  ;;  %2543 = vmatprep.subr.mxu1 %v1090_v51 }
  0xdd   :  { %2520 = vmatmul.mubr.msk.f32.vlgmr.msra.gmra.mxu0 %vm480_vm0, %v66_v41  ;;  %2570 = vmatprep.subr.mxu0 %v1094_v43 }
  0xde   :  { %1019 = vmatprep.mubr.f32.mxu0 %v2920_v34  ;;  %2571 = vmatpush3.msra.mxu0 %v1078_v44 }
  0xdf   :  { %2572 = vmatprep.subr.mxu0 %v1093_v45  ;;  %2544 = vmatpush3.msra.mxu1 %v1074_v52 }
  0xe0   :  { %2573 = vmatpush3.msra.mxu0 %v1077_v46  ;;  %2545 = vmatprep.subr.mxu1 %v1089_v53 }
  0xe1   :  { %2521 = vmatmul.mubr.msk.f32.gmra.mxu0 %vm480_vm0, %v79_v42  ;;  %2574 = vmatprep.subr.mxu0 %v1092_v47 }
  0xe2   :  { %2575 = vmatpush3.msra.mxu0 %v1076_v48  ;;  %2546 = vmatpush3.msra.mxu1 %v1073_v54 }
  0xe3   :  { %2576 = vmatprep.subr.mxu0 %v1091_v49  ;;  %2547 = vmatprep.subr.mxu1 %v1088_v55 }
  0xe4   :  { %2577 = vmatpush3.msra.mxu0 %v1075_v50  ;;  %2548 = vmatpush3.msra.mxu1 %v1072_v56 }
  0xe5   :  { %2578 = vmatprep.subr.mxu0 %v1090_v51  ;;  %2549 = vmatprep.subr.mxu1 %v1087_v57 }
  0xe6   :  { %2579 = vmatpush3.msra.mxu0 %v1074_v52  ;;  %2550 = vmatpush3.msra.mxu1 %v1071_v58 }
  0xe7   :  { %2580 = vmatprep.subr.mxu0 %v1089_v53  ;;  %2551 = vmatprep.subr.mxu1 %v1086_v59 }
  0xe8   :  { %2581 = vmatpush3.msra.mxu0 %v1073_v54  ;;  %2552 = vmatpush3.msra.mxu1 %v1070_v60 }
  0xe9   :  { %2582 = vmatprep.subr.mxu0 %v1088_v55  ;;  %2553 = vmatprep.subr.mxu1 %v1085_v61 }
  0xea   :  { %2583 = vmatpush3.msra.mxu0 %v1072_v56  ;;  %2554 = vmatpush3.msra.mxu1 %v1069_v62 }
  0xeb   :  { %2584 = vmatprep.subr.mxu0 %v1087_v57  ;;  %2555 = vmatprep.subr.mxu1 %v1084_v63 }
  0xec   :  { %2585 = vmatpush3.msra.mxu0 %v1071_v58  ;;  %2556 = vmatpush3.msra.mxu1 %v1068_v0 }
  0xed   :  { %2586 = vmatprep.subr.mxu0 %v1086_v59  ;;  %2557 = vmatprep.subr.mxu1 %v1083_v1 }
  0xee   :  { %2587 = vmatpush3.msra.mxu0 %v1070_v60  ;;  %2558 = vmatpush3.msra.mxu1 %v1067_v2 }
  0xef   :  { %2588 = vmatprep.subr.mxu0 %v1085_v61  ;;  %2559 = vmatprep.subr.mxu1 %v1082_v3 }
  0xf0   :  { %2589 = vmatpush3.msra.mxu0 %v1069_v62  ;;  %2560 = vmatpush3.msra.mxu1 %v1066_v4 }
  0xf1   :  { %2590 = vmatprep.subr.mxu0 %v1084_v63  ;;  %2561 = vmatprep.subr.mxu1 %v1081_v5 }
  0xf2   :  { %2591 = vmatpush3.msra.mxu0 %v1068_v0  ;;  %2562 = vmatpush3.msra.mxu1 %v1065_v6 }
  0xf3   :  { %2592 = vmatprep.subr.mxu0 %v1083_v1  ;;  %2563 = vmatprep.subr.mxu1 %v1080_v7 }
  0xf4   :  { %2593 = vmatpush3.msra.mxu0 %v1067_v2  ;;  %2564 = vmatpush3.msra.mxu1 %v1064_v8 }
  0xf5   :  { %2594 = vmatprep.subr.mxu0 %v1082_v3  ;;  %2565 = vmatprep.subr.mxu1 %v1079_v9 }
  0xf6   :  { %2595 = vmatpush3.msra.mxu0 %v1066_v4  ;;  %2566 = vmatpush3.msra.mxu1 %v1063_v10 }
  0xf7   :  { %2596 = vmatprep.subr.mxu0 %v1081_v5 }
  0xf8   :  { %2597 = vmatpush3.msra.mxu0 %v1065_v6 }
  0xf9   :  { %2598 = vmatprep.subr.mxu0 %v1080_v7 }
  0xfa   :  { %2599 = vmatpush3.msra.mxu0 %v1064_v8 }
  0xfb   :  { %2600 = vmatprep.subr.mxu0 %v1079_v9 }
  0xfc   :  { %2601 = vmatpush3.msra.mxu0 %v1063_v10 }
 0x104   :  { %v553_v11 = vpop.f32.mrf.mxu0 }
 0x105   :  { %v630_v13 = vpop.f32.mrf.mxu1 }
 0x106   :  { %v555_v12 = vpop.f32.mrf.mxu0  ;;  %v631_v28 = vadd.f32 %v630_v13, %v553_v11 }
 0x107   :  { %v632_v15 = vpop.f32.mrf.mxu1 }
 0x108   :  { %v633_v32 = vadd.f32 %v632_v15, %v555_v12 }
 0x140   :  { %v559_v14 = vpop.f32.mrf.mxu0 }
 0x141   :  { %v636_v17 = vpop.f32.mrf.mxu1 }
 0x142   :  { %v561_v16 = vpop.f32.mrf.mxu0  ;;  %v637_v31 = vadd.f32 %v636_v17, %v559_v14 }
 0x143   :  { %v638_v19 = vpop.f32.mrf.mxu1 }
 0x144   :  { %v639_v35 = vadd.f32 %v638_v19, %v561_v16 }
 0x147   :  { %v707_v18 = vpop.f32.mrf.mxu0 }
 0x148   :  { %v708_v33 = vadd.f32 %v707_v18, %v631_v28 }
 0x149   :  { %v709_v20 = vpop.f32.mrf.mxu0 }
 0x14a   :  { %v784_v21 = vpop.f32.mrf.mxu1  ;;  %v710_v37 = vadd.f32 %v709_v20, %v633_v32 }
 0x14b   :  { %v785_v41 = vadd.f32 %v784_v21, %v708_v33 }
 0x14c   :  { %v786_v23 = vpop.f32.mrf.mxu1 }
 0x14d   :  { %v713_v22 = vpop.f32.mrf.mxu0  ;;  %v787_v43 = vadd.f32 %v786_v23, %v710_v37  ;;  %v1247_v37 = vld [vmem:[%s5064_s4] sm:$0xff] }
 0x14e   :  { %v714_v36 = vadd.f32 %v713_v22, %v637_v31 }
 0x14f   :  { %v715_v24 = vpop.f32.mrf.mxu0 }
 0x150   :  { %v790_v25 = vpop.f32.mrf.mxu1  ;;  %v716_v40 = vadd.f32 %v715_v24, %v639_v35 }
 0x151   :  { %v791_v42 = vadd.f32 %v790_v25, %v714_v36 }
 0x152   :  { %v792_v27 = vpop.f32.mrf.mxu1 }
 0x153   :  { %v793_v47 = vadd.f32 %v792_v27, %v716_v40  ;;  %v1493_v40 = vld [vmem:[%s5066_s6 + $0x178] sm:$0xff] }
 0x18b   :  { %v861_v26 = vpop.f32.mrf.mxu0 }
 0x18c   :  { %v862_v44 = vadd.f32 %v861_v26, %v785_v41  ;;  %v1508_v41 = vld [vmem:[%s5066_s6 + $0x1f0] sm:$0xff] }
 0x18d   :  { %v863_v29 = vpop.f32.mrf.mxu0 }
 0x18e   :  { %v938_v30 = vpop.f32.mrf.mxu1  ;;  %v864_v49 = vadd.f32 %v863_v29, %v787_v43  ;;  %v1507_v43 = vld [vmem:[%s5066_s6 + $0x1e8] sm:$0xff] }
 0x18f   :  { %v939_v52 = vadd.f32 %v938_v30, %v862_v44  ;;  %v1491_v44 = vld [vmem:[%s5066_s6 + $0x168] sm:$0xff] }
 0x190   :  { %v940_v39 = vpop.f32.mrf.mxu1 }
 0x191   :  { %v867_v38 = vpop.f32.mrf.mxu0  ;;  %v941_v56 = vadd.f32 %v940_v39, %v864_v49  ;;  %v1509_v39 = vld [vmem:[%s5066_s6 + $0x1f8] sm:$0xff]  ;;  %v1504_v49 = vld [vmem:[%s5066_s6 + $0x1d0] sm:$0xff] }
 0x192   :  { %v944_v46 = vpop.f32.mrf.mxu1  ;;  %v868_v48 = vadd.f32 %v867_v38, %v791_v42  ;;  %v1249_v38 = vcombine.high %v1247_v37, %v1247_v37  ;;  %2640 = vmatprep.subr.mxu0 %v1509_v39  ;;  %v1492_v42 = vld [vmem:[%s5066_s6 + $0x170] sm:$0xff]  ;;  %v1466_v39 = vld [vmem:[%s5066_s6 + $0xa0] sm:$0xff] }
 0x193   :  { %v869_v45 = vpop.f32.mrf.mxu0 }
 0x194   :  { %v870_v51 = vadd.f32 %v869_v45, %v793_v47  ;;  %v946_v53 = vpop.f32.mrf.mxu1  ;;  %v945_v55 = vadd.f32 %v944_v46, %v868_v48  ;;  %2522 = vmatprep.subr.msk.mxu1 %vm1254_vm2, %v1249_v38  ;;  %v1506_v45 = vld [vmem:[%s5066_s6 + $0x1e0] sm:$0xff]  ;;  %v1505_v47 = vld [vmem:[%s5066_s6 + $0x1d8] sm:$0xff] }
 0x195   :  { %v1490_v46 = vld [vmem:[%s5066_s6 + $0x160] sm:$0xff]  ;;  %v1489_v48 = vld [vmem:[%s5066_s6 + $0x158] sm:$0xff] }
 0x196   :  { %v947_v59 = vadd.f32 %v946_v53, %v870_v51  ;;  %v1503_v51 = vld [vmem:[%s5066_s6 + $0x1c8] sm:$0xff]  ;;  %v1502_v53 = vld [vmem:[%s5066_s6 + $0x1c0] sm:$0xff] }
 0x19d   :  { %v1015_v50 = vpop.f32.mrf.mxu0 }
 0x19e   :  { %v4386_v57 = vadd.f32 %v1015_v50, %v939_v52  ;;  %v1488_v50 = vld [vmem:[%s5066_s6 + $0x150] sm:$0xff]  ;;  %v1487_v52 = vld [vmem:[%s5066_s6 + $0x148] sm:$0xff] }
 0x19f   :  { %v1017_v54 = vpop.f32.mrf.mxu0 }
 0x1a0   :  { %v4390_v61 = vadd.f32 %v1017_v54, %v941_v56  ;;  %v1043_v2 = vmul.f32 %v4386_v57, %v4386_v57  ;;  %v1486_v54 = vld [vmem:[%s5066_s6 + $0x140] sm:$0xff] }
 0x1a1   :  { %v1021_v58 = vpop.f32.mrf.mxu0 }
 0x1a2   :  { %v4388_v60 = vadd.f32 %v1021_v58, %v945_v55  ;;  %v1044_v7 = vmul.f32 %v4390_v61, %v4390_v61  ;;  %v1501_v55 = vld [vmem:[%s5066_s6 + $0x1b8] sm:$0xff] }
 0x1a3   :  { %v1023_v62 = vpop.f32.mrf.mxu0 }
 0x1a4   :  { %v1027_v63 = vsel %vm1026_vm1, %v4388_v60, 0.0  ;;  %v1045_v0 = vmul.f32 %v4388_v60, %v4388_v60  ;;  %v4396_v1 = vadd.f32 %v1023_v62, %v947_v59 }
 0x1a5   :  { %v1028_v3 = vadd.f32 %v1027_v63, %v4386_v57 }
 0x1a6   :  { %v1047_v4 = vsel %vm1026_vm1, %v1045_v0, 0.0  ;;  %v1035_v5 = vsel %vm1026_vm1, %v4396_v1, 0.0  ;;  %v1046_v6 = vmul.f32 %v4396_v1, %v4396_v1 }
 0x1a7   :  { %v1029_v8 = vrot.slane %v1028_v3, 4  ;;  %v1048_v9 = vadd.f32 %v1047_v4, %v1043_v2  ;;  %v1036_v10 = vadd.f32 %v1035_v5, %v4390_v61 }
 0x1a8   :  { %v1055_v11 = vsel %vm1026_vm1, %v1046_v6, 0.0 }
 0x1a9   :  { %v1030_v12 = vadd.f32 %v1029_v8, %v1028_v3  ;;  %v1049_v13 = vrot.slane %v1048_v9, 4  ;;  %v1037_v14 = vrot.slane %v1036_v10, 4  ;;  %v1056_v15 = vadd.f32 %v1055_v11, %v1044_v7  ;;  %v1240_v7 = vld [vmem:[%s5062_s2] sm:$0x1]  ;;  %v1477_v11 = vld [vmem:[%s5066_s6 + $0xf8] sm:$0xff] }
 0x1ab   :  { %v1031_v16 = vrot.slane %v1030_v12, 2  ;;  %v1050_v17 = vadd.f32 %v1049_v13, %v1048_v9  ;;  %v1038_v18 = vadd.f32 %v1037_v14, %v1036_v10  ;;  %v1057_v19 = vrot.slane %v1056_v15, 4  ;;  %v1244_v10 = vld [vmem:[%s5063_s3] sm:$0x1]  ;;  %v1461_v14 = vld [vmem:[%s5066_s6 + $0x78] sm:$0xff] }
 0x1ad   :  { %v1032_v20 = vadd.f32 %v1031_v16, %v1030_v12  ;;  %v1051_v21 = vrot.slane %v1050_v17, 2  ;;  %v1039_v22 = vrot.slane %v1038_v18, 2  ;;  %v1058_v23 = vadd.f32 %v1057_v19, %v1056_v15  ;;  %v1476_v15 = vld [vmem:[%s5066_s6 + $0xf0] sm:$0xff]  ;;  %v1474_v19 = vld [vmem:[%s5066_s6 + $0xe0] sm:$0xff] }
 0x1ae   :  { %v1460_v16 = vld [vmem:[%s5066_s6 + $0x70] sm:$0xff] }
 0x1af   :  { %v1052_v24 = vadd.f32 %v1051_v21, %v1050_v17  ;;  %v1040_v25 = vadd.f32 %v1039_v22, %v1038_v18  ;;  %v1059_v26 = vrot.slane %v1058_v23, 2  ;;  %v1033_v27 = vrot.slane %v1032_v20, 1  ;;  %v1475_v17 = vld [vmem:[%s5066_s6 + $0xe8] sm:$0xff]  ;;  %v1473_v21 = vld [vmem:[%s5066_s6 + $0xd8] sm:$0xff] }
 0x1b0   :  { %v1459_v18 = vld [vmem:[%s5066_s6 + $0x68] sm:$0xff]  ;;  %v1457_v22 = vld [vmem:[%s5066_s6 + $0x58] sm:$0xff] }
 0x1b1   :  { %v1041_v28 = vrot.slane %v1040_v25, 1  ;;  %v1060_v29 = vadd.f32 %v1059_v26, %v1058_v23  ;;  %v1053_v30 = vrot.slane %v1052_v24, 1  ;;  %v1034_v33 = vadd.f32 %v1033_v27, %v1032_v20  ;;  %v1458_v20 = vld [vmem:[%s5066_s6 + $0x60] sm:$0xff]  ;;  %v1472_v23 = vld [vmem:[%s5066_s6 + $0xd0] sm:$0xff]  ;;  %v1455_v26 = vld [vmem:[%s5066_s6 + $0x48] sm:$0xff] }
 0x1b2   :  { %v1470_v27 = vld [vmem:[%s5066_s6 + $0xc0] sm:$0xff] }
 0x1b3   :  { %v1042_v31 = vadd.f32 %v1041_v28, %v1040_v25  ;;  %v1061_v32 = vrot.slane %v1060_v29, 1  ;;  %v1054_v36 = vadd.f32 %v1053_v30, %v1052_v24  ;;  %v1456_v24 = vld [vmem:[%s5066_s6 + $0x50] sm:$0xff]  ;;  %v1471_v25 = vld [vmem:[%s5066_s6 + $0xc8] sm:$0xff]  ;;  %v1454_v28 = vld [vmem:[%s5066_s6 + $0x40] sm:$0xff] }
 0x1b4   :  { %v1453_v30 = vld [vmem:[%s5066_s6 + $0x38] sm:$0xff] }
 0x1b5   :  { %1159 = vmatprep.mubr.f32.mxu1 %v1042_v31  ;;  %v1062_v35 = vadd.f32 %v1061_v32, %v1060_v29  ;;  %v1469_v29 = vld [vmem:[%s5066_s6 + $0xb8] sm:$0xff]  ;;  %v1468_v31 = vld [vmem:[%s5066_s6 + $0xb0] sm:$0xff] }
 0x1b6   :  { %1160 = vmatmul.mubr.f32.vlgmr.msra.gmra.mxu1 %v1034_v33  ;;  %v1452_v32 = vld [vmem:[%s5066_s6 + $0x30] sm:$0xff]  ;;  %v1485_v33 = vld [vmem:[%s5066_s6 + $0x138] sm:$0xff] }
 0x1b7   :  { %1229 = vmatprep.mubr.f32.mxu0 %v1062_v35  ;;  %1323 = vmatprep.mubr.f32.mxu1 %v2920_v34  ;;  %v1467_v35 = vld [vmem:[%s5066_s6 + $0xa8] sm:$0xff] }
 0x1b8   :  { %1230 = vmatmul.mubr.f32.vlgmr.msra.gmra.mxu0 %v1054_v36  ;;  %2523 = vmatpush1.msk.msra.mxu1 %vm1254_vm2, %v1247_v37  ;;  %v1500_v36 = vld [vmem:[%s5066_s6 + $0x1b0] sm:$0xff] }
 0x1b9   :  { %2525 = vmatprep.subr.msk.mxu1 %vm1254_vm2, %v1249_v38  ;;  %2641 = vmatpush3.msra.mxu0 %v1493_v40  ;;  %v1484_v38 = vld [vmem:[%s5066_s6 + $0x130] sm:$0xff]  ;;  %v1499_v40 = vld [vmem:[%s5066_s6 + $0x1a8] sm:$0xff] }
 0x1ba   :  { %2642 = vmatprep.subr.mxu0 %v1508_v41  ;;  %v1450_v41 = vld [vmem:[%s5066_s6 + $0x20] sm:$0xff] }
 0x1bb   :  { %2643 = vmatpush3.msra.mxu0 %v1492_v42  ;;  %v1483_v42 = vld [vmem:[%s5066_s6 + $0x128] sm:$0xff] }
 0x1bc   :  { %2644 = vmatprep.subr.mxu0 %v1507_v43  ;;  %v1465_v43 = vld [vmem:[%s5066_s6 + $0x98] sm:$0xff] }
 0x1bd   :  { %2645 = vmatpush3.msra.mxu0 %v1491_v44  ;;  %v1498_v44 = vld [vmem:[%s5066_s6 + $0x1a0] sm:$0xff] }
 0x1be   :  { %2646 = vmatprep.subr.mxu0 %v1506_v45  ;;  %v1449_v45 = vld [vmem:[%s5066_s6 + $0x18] sm:$0xff] }
 0x1bf   :  { %2647 = vmatpush3.msra.mxu0 %v1490_v46  ;;  %v1482_v46 = vld [vmem:[%s5066_s6 + $0x120] sm:$0xff] }
 0x1c0   :  { %2648 = vmatprep.subr.mxu0 %v1505_v47  ;;  %v1464_v47 = vld [vmem:[%s5066_s6 + $0x90] sm:$0xff] }
 0x1c1   :  { %2649 = vmatpush3.msra.mxu0 %v1489_v48  ;;  %v1497_v48 = vld [vmem:[%s5066_s6 + $0x198] sm:$0xff] }
 0x1c2   :  { %2650 = vmatprep.subr.mxu0 %v1504_v49  ;;  %v1448_v49 = vld [vmem:[%s5066_s6 + $0x10] sm:$0xff] }
 0x1c3   :  { %2651 = vmatpush3.msra.mxu0 %v1488_v50  ;;  %v1481_v50 = vld [vmem:[%s5066_s6 + $0x118] sm:$0xff] }
 0x1c4   :  { %2652 = vmatprep.subr.mxu0 %v1503_v51  ;;  %v1463_v51 = vld [vmem:[%s5066_s6 + $0x88] sm:$0xff] }
 0x1c5   :  { %2653 = vmatpush3.msra.mxu0 %v1487_v52  ;;  %v1496_v52 = vld [vmem:[%s5066_s6 + $0x190] sm:$0xff] }
 0x1c6   :  { %2654 = vmatprep.subr.mxu0 %v1502_v53  ;;  %v1447_v53 = vld [vmem:[%s5066_s6 + $0x8] sm:$0xff] }
 0x1c7   :  { %2655 = vmatpush3.msra.mxu0 %v1486_v54  ;;  %v1480_v54 = vld [vmem:[%s5066_s6 + $0x110] sm:$0xff] }
 0x1c8   :  { %2656 = vmatprep.subr.mxu0 %v1501_v55  ;;  %v1462_v55 = vld [vmem:[%s5066_s6 + $0x80] sm:$0xff] }
 0x1c9   :  { %2657 = vmatpush3.msra.mxu0 %v1485_v33  ;;  %v1522_v33 = vld [vmem:[%s5066_s6 + $0x260] sm:$0xff] }
 0x1ca   :  { %2658 = vmatprep.subr.mxu0 %v1500_v36  ;;  %v1537_v36 = vld [vmem:[%s5066_s6 + $0x2d8] sm:$0xff] }
 0x1cb   :  { %2659 = vmatpush3.msra.mxu0 %v1484_v38  ;;  %v1521_v38 = vld [vmem:[%s5066_s6 + $0x258] sm:$0xff] }
 0x1cc   :  { %2660 = vmatprep.subr.mxu0 %v1499_v40  ;;  %v1536_v40 = vld [vmem:[%s5066_s6 + $0x2d0] sm:$0xff] }
 0x1cd   :  { %2661 = vmatpush3.msra.mxu0 %v1483_v42  ;;  %v1520_v42 = vld [vmem:[%s5066_s6 + $0x250] sm:$0xff] }
 0x1ce   :  { %2662 = vmatprep.subr.mxu0 %v1498_v44  ;;  %v1535_v44 = vld [vmem:[%s5066_s6 + $0x2c8] sm:$0xff] }
 0x1cf   :  { %2663 = vmatpush3.msra.mxu0 %v1482_v46  ;;  %v1519_v46 = vld [vmem:[%s5066_s6 + $0x248] sm:$0xff] }
 0x1d0   :  { %2664 = vmatprep.subr.mxu0 %v1497_v48  ;;  %v1534_v48 = vld [vmem:[%s5066_s6 + $0x2c0] sm:$0xff] }
 0x1d1   :  { %2665 = vmatpush3.msra.mxu0 %v1481_v50  ;;  %v1518_v50 = vld [vmem:[%s5066_s6 + $0x240] sm:$0xff] }
 0x1d2   :  { %2666 = vmatprep.subr.mxu0 %v1496_v52  ;;  %v1533_v52 = vld [vmem:[%s5066_s6 + $0x2b8] sm:$0xff] }
 0x1d3   :  { %2667 = vmatpush3.msra.mxu0 %v1480_v54  ;;  %v1517_v54 = vld [vmem:[%s5066_s6 + $0x238] sm:$0xff] }
 0x276   :  { %v2567_v56 = vpop.f32.mrf.mxu1 }
 0x278   :  { %v2568_v58 = vpop.f32.mrf.mxu1  ;;  %v2602_v59 = vpop.f32.mrf.mxu0 }
 0x279   :  { %v2569_v62 = vadd.f32 %v2568_v58, %v2567_v56  ;;  %v1495_v56 = vld [vmem:[%s5066_s6 + $0x188] sm:$0xff]  ;;  %v1446_v58 = vld [vmem:[%s5066_s6] sm:$0xff] }
 0x27a   :  { %v2603_v63 = vpop.f32.mrf.mxu0  ;;  %2668 = vmatprep.subr.mxu0 %v1495_v56  ;;  %v1532_v56 = vld [vmem:[%s5066_s6 + $0x2b0] sm:$0xff] }
 0x27b   :  { %v1236_v0 = vmul.f32 0.004, %v2569_v62  ;;  %v2604_v2 = vadd.f32 %v2603_v63, %v2602_v59  ;;  %v1479_v59 = vld [vmem:[%s5066_s6 + $0x108] sm:$0xff]  ;;  %v1494_v62 = vld [vmem:[%s5066_s6 + $0x180] sm:$0xff]  ;;  %v1541_v63 = vld [vmem:[%s5066_s6 + $0x2f8] sm:$0xff] }
 0x27c   :  { %2669 = vmatpush3.msra.mxu0 %v1479_v59  ;;  %v1516_v59 = vld [vmem:[%s5066_s6 + $0x230] sm:$0xff] }
 0x27d   :  { %v1238_v3 = vmul.f32 %v1236_v0, %v1236_v0  ;;  %v1237_v4 = vmul.f32 0.004, %v2604_v2  ;;  %2670 = vmatprep.subr.mxu0 %v1494_v62  ;;  %v1573_v2 = vld [vmem:[%s5066_s6 + $0x3f8] sm:$0xff] }
 0x27e   :  { %v1549_v62 = vld [vmem:[%s5066_s6 + $0x338] sm:$0xff] }
 0x27f   :  { %v1239_v5 = vsub.f32 %v1237_v4, %v1238_v3  ;;  %v1404_v3 = vlaneseq }
 0x281   :  { %v1241_v6 = vadd.f32 1e-05, %v1239_v5  ;;  %v1405_v4 = vshrl.u32 %v1404_v3, 7  ;;  %v1548_v3 = vld [vmem:[%s5066_s6 + $0x330] sm:$0xff] }
 0x283   :  { %2892 = vrsqrt.f32 %v1241_v6  ;;  %v4623_v5 = vsub.s32 0, %v1405_v4  ;;  %v1530_v4 = vld [vmem:[%s5066_s6 + $0x2a0] sm:$0xff] }
 0x290   :  { %v2893_v8 = vpop.eup %2892 }
 0x291   :  { %v1243_v9 = vmul.f32 %v2893_v8, %v1240_v7 }
 0x293   :  { %2524 = vmatmul.mubr.msk.f32.vlgmr.msra.gmra.mxu1 %vm1250_vm3, %v1243_v9  ;;  %v1245_v12 = vmul.f32 %v1243_v9, %v1236_v0  ;;  %v1478_v0 = vld [vmem:[%s5066_s6 + $0x100] sm:$0xff] }
 0x294   :  { %2526 = vmatpush1.msk.msra.mxu1 %vm1254_vm2, %v1247_v37  ;;  %1397 = vmatprep.mubr.f32.mxu1 %v2920_v34  ;;  %v1451_v37 = vld [vmem:[%s5066_s6 + $0x28] sm:$0xff] }
 0x295   :  { %v1246_v13 = vsub.f32 %v1244_v10, %v1245_v12  ;;  %2605 = vmatprep.subr.mxu1 %v1477_v11  ;;  %2671 = vmatpush3.msra.mxu0 %v1478_v0  ;;  %v1564_v0 = vld [vmem:[%s5066_s6 + $0x3b0] sm:$0xff] }
 0x296   :  { %2710 = vmatprep.subr.mxu0 %v1573_v2  ;;  %v1515_v2 = vld [vmem:[%s5066_s6 + $0x228] sm:$0xff] }
 0x297   :  { %2527 = vmatmul.mubr.msk.f32.vlgmr.msra.gmra.mxu1 %vm1250_vm3, %v1246_v13 }
 0x298   :  { %2606 = vmatpush3.msra.mxu1 %v1461_v14 }
 0x299   :  { %2607 = vmatprep.subr.mxu1 %v1476_v15 }
 0x29a   :  { %2608 = vmatpush3.msra.mxu1 %v1460_v16 }
 0x29b   :  { %2609 = vmatprep.subr.mxu1 %v1475_v17 }
 0x29c   :  { %2610 = vmatpush3.msra.mxu1 %v1459_v18 }
 0x29d   :  { %2611 = vmatprep.subr.mxu1 %v1474_v19 }
 0x29e   :  { %2612 = vmatpush3.msra.mxu1 %v1458_v20 }
 0x29f   :  { %2613 = vmatprep.subr.mxu1 %v1473_v21 }
 0x2a0   :  { %2614 = vmatpush3.msra.mxu1 %v1457_v22 }
 0x2a1   :  { %2615 = vmatprep.subr.mxu1 %v1472_v23  ;;  %v1524_v23 = vld [vmem:[%s5066_s6 + $0x270] sm:$0xff] }
 0x2a2   :  { %2616 = vmatpush3.msra.mxu1 %v1456_v24 }
 0x2a3   :  { %2617 = vmatprep.subr.mxu1 %v1471_v25  ;;  %v1557_v25 = vld [vmem:[%s5066_s6 + $0x378] sm:$0xff] }
 0x2a4   :  { %2618 = vmatpush3.msra.mxu1 %v1455_v26  ;;  %v1539_v26 = vld [vmem:[%s5066_s6 + $0x2e8] sm:$0xff] }
 0x2a5   :  { %2619 = vmatprep.subr.mxu1 %v1470_v27  ;;  %v1572_v27 = vld [vmem:[%s5066_s6 + $0x3f0] sm:$0xff] }
 0x2a6   :  { %2620 = vmatpush3.msra.mxu1 %v1454_v28 }
 0x2a7   :  { %2621 = vmatprep.subr.mxu1 %v1469_v29  ;;  %v1523_v29 = vld [vmem:[%s5066_s6 + $0x268] sm:$0xff] }
 0x2a8   :  { %2622 = vmatpush3.msra.mxu1 %v1453_v30  ;;  %v1556_v30 = vld [vmem:[%s5066_s6 + $0x370] sm:$0xff] }
 0x2a9   :  { %2623 = vmatprep.subr.mxu1 %v1468_v31  ;;  %v1538_v31 = vld [vmem:[%s5066_s6 + $0x2e0] sm:$0xff] }
 0x2aa   :  { %2624 = vmatpush3.msra.mxu1 %v1452_v32  ;;  %v1571_v32 = vld [vmem:[%s5066_s6 + $0x3e8] sm:$0xff] }
 0x2ab   :  { %2625 = vmatprep.subr.mxu1 %v1467_v35  ;;  %v1555_v35 = vld [vmem:[%s5066_s6 + $0x368] sm:$0xff] }
 0x2ac   :  { %2626 = vmatpush3.msra.mxu1 %v1451_v37  ;;  %v1570_v37 = vld [vmem:[%s5066_s6 + $0x3e0] sm:$0xff] }
 0x2ad   :  { %2627 = vmatprep.subr.mxu1 %v1466_v39  ;;  %v1554_v39 = vld [vmem:[%s5066_s6 + $0x360] sm:$0xff] }
 0x2ae   :  { %2628 = vmatpush3.msra.mxu1 %v1450_v41  ;;  %v1569_v41 = vld [vmem:[%s5066_s6 + $0x3d8] sm:$0xff] }
 0x2af   :  { %2629 = vmatprep.subr.mxu1 %v1465_v43  ;;  %v1553_v43 = vld [vmem:[%s5066_s6 + $0x358] sm:$0xff] }
 0x2b0   :  { %2630 = vmatpush3.msra.mxu1 %v1449_v45  ;;  %v1568_v45 = vld [vmem:[%s5066_s6 + $0x3d0] sm:$0xff] }
 0x2b1   :  { %2631 = vmatprep.subr.mxu1 %v1464_v47  ;;  %v1552_v47 = vld [vmem:[%s5066_s6 + $0x350] sm:$0xff] }
 0x2b2   :  { %2632 = vmatpush3.msra.mxu1 %v1448_v49  ;;  %v1567_v49 = vld [vmem:[%s5066_s6 + $0x3c8] sm:$0xff] }
 0x2b3   :  { %2633 = vmatprep.subr.mxu1 %v1463_v51  ;;  %v1551_v51 = vld [vmem:[%s5066_s6 + $0x348] sm:$0xff] }
 0x2b4   :  { %2634 = vmatpush3.msra.mxu1 %v1447_v53  ;;  %v1566_v53 = vld [vmem:[%s5066_s6 + $0x3c0] sm:$0xff] }
 0x2b5   :  { %2635 = vmatprep.subr.mxu1 %v1462_v55  ;;  %v1550_v55 = vld [vmem:[%s5066_s6 + $0x340] sm:$0xff] }
 0x2b6   :  { %2636 = vmatpush3.msra.mxu1 %v1446_v58  ;;  %v1565_v58 = vld [vmem:[%s5066_s6 + $0x3b8] sm:$0xff] }
 0x2b7   :  { %2675 = vmatprep.subr.mxu1 %v1541_v63  ;;  %v1531_v63 = vld [vmem:[%s5066_s6 + $0x2a8] sm:$0xff] }
 0x353   :  { %v1325_v6 = vpop.f32.mrf.mxu1 }
 0x354   :  { %v1407_v7 = vrot.slane %v1325_v6, %v4623_v5  ;;  %v1563_v6 = vld [vmem:[%s5066_s6 + $0x3a8] sm:$0xff] }
 0x355   :  { %v1327_v8 = vpop.f32.mrf.mxu1 }
 0x356   :  { %v4627_v9 = vrot.slane %v1327_v8, %v4623_v5  ;;  %v1412_v11 = vmul.f32 %v1407_v7, %v4386_v57  ;;  %v1414_v12 = vmul.f32 %v1407_v7, %v4388_v60  ;;  %v1525_v57 = vld [vmem:[%s5066_s6 + $0x278] sm:$0xff]  ;;  %v1514_v7 = vld [vmem:[%s5066_s6 + $0x220] sm:$0xff]  ;;  %v1547_v8 = vld [vmem:[%s5066_s6 + $0x328] sm:$0xff] }
 0x357   :  { %v1399_v10 = vpop.f32.mrf.mxu1 }
 0x358   :  { %v1419_v13 = vrot.slane %v1399_v10, %v4623_v5  ;;  %v1413_v15 = vmul.f32 %v4627_v9, %v4390_v61  ;;  %v1540_v61 = vld [vmem:[%s5066_s6 + $0x2f0] sm:$0xff]  ;;  %v1529_v10 = vld [vmem:[%s5066_s6 + $0x298] sm:$0xff] }
 0x359   :  { %v1401_v14 = vpop.f32.mrf.mxu1 }
 0x35a   :  { %v1424_v16 = vadd.f32 %v1419_v13, %v1412_v11  ;;  %v4634_v17 = vadd.f32 %v1419_v13, %v1414_v12  ;;  %v4637_v18 = vrot.slane %v1401_v14, %v4623_v5  ;;  %v1562_v11 = vld [vmem:[%s5066_s6 + $0x3a0] sm:$0xff]  ;;  %v1513_v12 = vld [vmem:[%s5066_s6 + $0x218] sm:$0xff]  ;;  %v1528_v14 = vld [vmem:[%s5066_s6 + $0x290] sm:$0xff] }
 0x35b   :  { %v1546_v13 = vld [vmem:[%s5066_s6 + $0x320] sm:$0xff] }
 0x35c   :  { %v1425_v19 = vadd.f32 %v4637_v18, %v1413_v15  ;;  %v4640_v20 = vmax.f32 %v1424_v16, 0.0  ;;  %v1561_v15 = vld [vmem:[%s5066_s6 + $0x398] sm:$0xff]  ;;  %v1512_v16 = vld [vmem:[%s5066_s6 + $0x210] sm:$0xff] }
 0x35e   :  { %v1429_v21 = vmax.f32 %v1425_v19, 0.0  ;;  %v1434_v24 = vrot.slane %v4640_v20, 2  ;;  %v1545_v19 = vld [vmem:[%s5066_s6 + $0x318] sm:$0xff] }
 0x360   :  { %1670 = vmatprep.mubr.f32.mxu1 %v1429_v21  ;;  %v1435_v60 = vrot.slane %v1429_v21, 2  ;;  %v1439_v22 = vrot.slane %v1429_v21, 4  ;;  %v1443_v28 = vrot.slane %v1429_v21, 6  ;;  %v1527_v21 = vld [vmem:[%s5066_s6 + $0x288] sm:$0xff] }
 0x361   :  { %1671 = vmatmul.mubr.f32.vlgmr.msra.gmra.mxu1 %v4640_v20 }
 0x362   :  { %2676 = vmatpush3.msra.mxu1 %v1525_v57  ;;  %1740 = vmatprep.mubr.f32.mxu0 %v1435_v60  ;;  %v1560_v57 = vld [vmem:[%s5066_s6 + $0x390] sm:$0xff]  ;;  %v1415_v60 = vmul.f32 %v4627_v9, %v4396_v1  ;;  %v1559_v1 = vld [vmem:[%s5066_s6 + $0x388] sm:$0xff] }
 0x363   :  { %2677 = vmatprep.subr.mxu1 %v1540_v61  ;;  %1810 = vmatprep.mubr.f32.mxu1 %v1439_v22  ;;  %v1511_v61 = vld [vmem:[%s5066_s6 + $0x208] sm:$0xff]  ;;  %v1544_v22 = vld [vmem:[%s5066_s6 + $0x310] sm:$0xff] }
 0x364   :  { %1741 = vmatmul.mubr.f32.vlgmr.msra.gmra.mxu0 %v1434_v24  ;;  %2678 = vmatpush3.msra.mxu1 %v1524_v23  ;;  %v1526_v23 = vld [vmem:[%s5066_s6 + $0x280] sm:$0xff]  ;;  %v1427_v9 = vadd.f32 %v4637_v18, %v1415_v60  ;;  %v1438_v18 = vrot.slane %v4640_v20, 4 }
 0x365   :  { %2711 = vmatpush3.msra.mxu0 %v1557_v25  ;;  %2679 = vmatprep.subr.mxu1 %v1539_v26  ;;  %v1510_v24 = vld [vmem:[%s5066_s6 + $0x200] sm:$0xff]  ;;  %v1543_v25 = vld [vmem:[%s5066_s6 + $0x308] sm:$0xff] }
 0x366   :  { %2712 = vmatprep.subr.mxu0 %v1572_v27  ;;  %1880 = vmatprep.mubr.f32.mxu0 %v1443_v28  ;;  %v1558_v26 = vld [vmem:[%s5066_s6 + $0x380] sm:$0xff]  ;;  %v1605_v27 = vld [vmem:[%s5066_s6 + $0x4f8] sm:$0xff] }
 0x367   :  { %2680 = vmatpush3.msra.mxu1 %v1523_v29  ;;  %2713 = vmatpush3.msra.mxu0 %v1556_v30  ;;  %v1542_v28 = vld [vmem:[%s5066_s6 + $0x300] sm:$0xff]  ;;  %v1589_v29 = vld [vmem:[%s5066_s6 + $0x478] sm:$0xff]  ;;  %v1431_v30 = vmax.f32 %v1427_v9, 0.0 }
 0x368   :  { %2681 = vmatprep.subr.mxu1 %v1538_v31  ;;  %2714 = vmatprep.subr.mxu0 %v1571_v32  ;;  %v1604_v31 = vld [vmem:[%s5066_s6 + $0x4f0] sm:$0xff]  ;;  %v1442_v32 = vrot.slane %v4640_v20, 6  ;;  %v1602_v20 = vld [vmem:[%s5066_s6 + $0x4e0] sm:$0xff] }
 0x369   :  { %2682 = vmatpush3.msra.mxu1 %v1522_v33  ;;  %2715 = vmatpush3.msra.mxu0 %v1555_v35  ;;  %v1588_v33 = vld [vmem:[%s5066_s6 + $0x470] sm:$0xff]  ;;  %v1603_v35 = vld [vmem:[%s5066_s6 + $0x4e8] sm:$0xff] }
 0x36a   :  { %2683 = vmatprep.subr.mxu1 %v1537_v36  ;;  %2716 = vmatprep.subr.mxu0 %v1570_v37  ;;  %v1587_v36 = vld [vmem:[%s5066_s6 + $0x468] sm:$0xff]  ;;  %v1586_v37 = vld [vmem:[%s5066_s6 + $0x460] sm:$0xff] }
 0x36b   :  { %2684 = vmatpush3.msra.mxu1 %v1521_v38  ;;  %2717 = vmatpush3.msra.mxu0 %v1554_v39  ;;  %v1601_v38 = vld [vmem:[%s5066_s6 + $0x4d8] sm:$0xff] }
 0x36c   :  { %2685 = vmatprep.subr.mxu1 %v1536_v40  ;;  %2718 = vmatprep.subr.mxu0 %v1569_v41  ;;  %v1585_v39 = vld [vmem:[%s5066_s6 + $0x458] sm:$0xff]  ;;  %v1600_v40 = vld [vmem:[%s5066_s6 + $0x4d0] sm:$0xff] }
 0x36d   :  { %2686 = vmatpush3.msra.mxu1 %v1520_v42  ;;  %2719 = vmatpush3.msra.mxu0 %v1553_v43  ;;  %v1584_v41 = vld [vmem:[%s5066_s6 + $0x450] sm:$0xff]  ;;  %v1599_v42 = vld [vmem:[%s5066_s6 + $0x4c8] sm:$0xff] }
 0x36e   :  { %2687 = vmatprep.subr.mxu1 %v1535_v44  ;;  %2720 = vmatprep.subr.mxu0 %v1568_v45  ;;  %v1583_v43 = vld [vmem:[%s5066_s6 + $0x448] sm:$0xff]  ;;  %v1598_v44 = vld [vmem:[%s5066_s6 + $0x4c0] sm:$0xff] }
 0x36f   :  { %2688 = vmatpush3.msra.mxu1 %v1519_v46  ;;  %2721 = vmatpush3.msra.mxu0 %v1552_v47  ;;  %v1582_v45 = vld [vmem:[%s5066_s6 + $0x440] sm:$0xff]  ;;  %v1597_v46 = vld [vmem:[%s5066_s6 + $0x4b8] sm:$0xff] }
 0x370   :  { %2689 = vmatprep.subr.mxu1 %v1534_v48  ;;  %2722 = vmatprep.subr.mxu0 %v1567_v49  ;;  %v1581_v47 = vld [vmem:[%s5066_s6 + $0x438] sm:$0xff]  ;;  %v1596_v48 = vld [vmem:[%s5066_s6 + $0x4b0] sm:$0xff] }
 0x371   :  { %2690 = vmatpush3.msra.mxu1 %v1518_v50  ;;  %2723 = vmatpush3.msra.mxu0 %v1551_v51  ;;  %v1580_v49 = vld [vmem:[%s5066_s6 + $0x430] sm:$0xff]  ;;  %v1595_v50 = vld [vmem:[%s5066_s6 + $0x4a8] sm:$0xff] }
 0x372   :  { %2691 = vmatprep.subr.mxu1 %v1533_v52  ;;  %2724 = vmatprep.subr.mxu0 %v1566_v53  ;;  %v1579_v51 = vld [vmem:[%s5066_s6 + $0x428] sm:$0xff]  ;;  %v1594_v52 = vld [vmem:[%s5066_s6 + $0x4a0] sm:$0xff] }
 0x373   :  { %2692 = vmatpush3.msra.mxu1 %v1517_v54  ;;  %2725 = vmatpush3.msra.mxu0 %v1550_v55  ;;  %v1578_v53 = vld [vmem:[%s5066_s6 + $0x420] sm:$0xff]  ;;  %v1593_v54 = vld [vmem:[%s5066_s6 + $0x498] sm:$0xff] }
 0x374   :  { %2693 = vmatprep.subr.mxu1 %v1532_v56  ;;  %2726 = vmatprep.subr.mxu0 %v1565_v58  ;;  %v1577_v55 = vld [vmem:[%s5066_s6 + $0x418] sm:$0xff]  ;;  %v1592_v56 = vld [vmem:[%s5066_s6 + $0x490] sm:$0xff] }
 0x375   :  { %2694 = vmatpush3.msra.mxu1 %v1516_v59  ;;  %2727 = vmatpush3.msra.mxu0 %v1549_v62  ;;  %v1576_v58 = vld [vmem:[%s5066_s6 + $0x410] sm:$0xff]  ;;  %v1591_v59 = vld [vmem:[%s5066_s6 + $0x488] sm:$0xff] }
 0x376   :  { %2695 = vmatprep.subr.mxu1 %v1531_v63  ;;  %2728 = vmatprep.subr.mxu0 %v1564_v0  ;;  %v1575_v62 = vld [vmem:[%s5066_s6 + $0x408] sm:$0xff]  ;;  %v1590_v63 = vld [vmem:[%s5066_s6 + $0x480] sm:$0xff] }
 0x377   :  { %2696 = vmatpush3.msra.mxu1 %v1515_v2  ;;  %2729 = vmatpush3.msra.mxu0 %v1548_v3  ;;  %v1574_v0 = vld [vmem:[%s5066_s6 + $0x400] sm:$0xff]  ;;  %v1430_v2 = vmax.f32 %v4634_v17, 0.0  ;;  %v1979_v3 = vld [vmem:[%s5070_s10 + $0x38] sm:$0xff]  ;;  %v1977_v17 = vld [vmem:[%s5070_s10 + $0x28] sm:$0xff] }
 0x378   :  { %2697 = vmatprep.subr.mxu1 %v1530_v4  ;;  %2730 = vmatprep.subr.mxu0 %v1563_v6  ;;  %v1978_v4 = vld [vmem:[%s5070_s10 + $0x30] sm:$0xff]  ;;  %v1976_v6 = vld [vmem:[%s5070_s10 + $0x20] sm:$0xff] }
 0x379   :  { %2698 = vmatpush3.msra.mxu1 %v1514_v7  ;;  %2731 = vmatpush3.msra.mxu0 %v1547_v8  ;;  %v1975_v7 = vld [vmem:[%s5070_s10 + $0x18] sm:$0xff]  ;;  %v1974_v8 = vld [vmem:[%s5070_s10 + $0x10] sm:$0xff] }
 0x37a   :  { %2699 = vmatprep.subr.mxu1 %v1529_v10  ;;  %2732 = vmatprep.subr.mxu0 %v1562_v11  ;;  %v1973_v10 = vld [vmem:[%s5070_s10 + $0x8] sm:$0xff]  ;;  %v1972_v11 = vld [vmem:[%s5070_s10] sm:$0xff] }
 0x37b   :  { %2700 = vmatpush3.msra.mxu1 %v1513_v12  ;;  %2733 = vmatpush3.msra.mxu0 %v1546_v13 }
 0x37c   :  { %2701 = vmatprep.subr.mxu1 %v1528_v14  ;;  %2734 = vmatprep.subr.mxu0 %v1561_v15 }
 0x37d   :  { %2702 = vmatpush3.msra.mxu1 %v1512_v16  ;;  %2735 = vmatpush3.msra.mxu0 %v1545_v19 }
 0x37e   :  { %2703 = vmatprep.subr.mxu1 %v1527_v21  ;;  %2736 = vmatprep.subr.mxu0 %v1560_v57 }
 0x37f   :  { %2704 = vmatpush3.msra.mxu1 %v1511_v61  ;;  %2737 = vmatpush3.msra.mxu0 %v1544_v22 }
 0x380   :  { %2705 = vmatprep.subr.mxu1 %v1526_v23  ;;  %2738 = vmatprep.subr.mxu0 %v1559_v1 }
 0x381   :  { %2706 = vmatpush3.msra.mxu1 %v1510_v24  ;;  %2739 = vmatpush3.msra.mxu0 %v1543_v25 }
 0x382   :  { %1811 = vmatmul.mubr.f32.vlgmr.msra.gmra.mxu1 %v1438_v18  ;;  %2740 = vmatprep.subr.mxu0 %v1558_v26 }
 0x383   :  { %2745 = vmatprep.subr.mxu1 %v1605_v27  ;;  %2741 = vmatpush3.msra.mxu0 %v1542_v28 }
 0x384   :  { %2746 = vmatpush3.msra.mxu1 %v1589_v29  ;;  %1950 = vmatprep.mubr.f32.mxu1 %v1431_v30 }
 0x385   :  { %1881 = vmatmul.mubr.f32.vlgmr.msra.gmra.mxu0 %v1442_v32  ;;  %2747 = vmatprep.subr.mxu1 %v1604_v31 }
 0x386   :  { %2748 = vmatpush3.msra.mxu1 %v1588_v33  ;;  %2814 = vmatprep.subr.mxu0 %v2920_v34 }
 0x387   :  { %2749 = vmatprep.subr.mxu1 %v1603_v35  ;;  %2815 = vmatpush3.msra.mxu0 %v1979_v3 }
 0x388   :  { %2750 = vmatpush3.msra.mxu1 %v1587_v36  ;;  %2816 = vmatprep.subr.mxu0 %v2920_v34 }
 0x389   :  { %2751 = vmatprep.subr.mxu1 %v1602_v20  ;;  %2817 = vmatpush3.msra.mxu0 %v1978_v4 }
 0x38a   :  { %2752 = vmatpush3.msra.mxu1 %v1586_v37  ;;  %2818 = vmatprep.subr.mxu0 %v2920_v34 }
 0x38b   :  { %2753 = vmatprep.subr.mxu1 %v1601_v38  ;;  %2819 = vmatpush3.msra.mxu0 %v1977_v17 }
 0x38c   :  { %2754 = vmatpush3.msra.mxu1 %v1585_v39  ;;  %2820 = vmatprep.subr.mxu0 %v2920_v34 }
 0x38d   :  { %2755 = vmatprep.subr.mxu1 %v1600_v40  ;;  %2821 = vmatpush3.msra.mxu0 %v1976_v6 }
 0x38e   :  { %2756 = vmatpush3.msra.mxu1 %v1584_v41  ;;  %2822 = vmatprep.subr.mxu0 %v2920_v34 }
 0x38f   :  { %2757 = vmatprep.subr.mxu1 %v1599_v42  ;;  %2823 = vmatpush3.msra.mxu0 %v1975_v7 }
 0x390   :  { %2758 = vmatpush3.msra.mxu1 %v1583_v43  ;;  %2824 = vmatprep.subr.mxu0 %v2920_v34  ;;  %v2138_v43 = vld [vmem:[%s5069_s9] sm:$0xff] }
 0x391   :  { %2759 = vmatprep.subr.mxu1 %v1598_v44  ;;  %2825 = vmatpush3.msra.mxu0 %v1974_v8  ;;  %v2304_v44 = vld [vmem:[%s5071_s11 + $0x38] sm:$0xff] }
 0x392   :  { %2760 = vmatpush3.msra.mxu1 %v1582_v45  ;;  %2826 = vmatprep.subr.mxu0 %v2920_v34  ;;  %v2303_v45 = vld [vmem:[%s5071_s11 + $0x30] sm:$0xff] }
 0x393   :  { %2761 = vmatprep.subr.mxu1 %v1597_v46  ;;  %2827 = vmatpush3.msra.mxu0 %v1973_v10 }
 0x394   :  { %2762 = vmatpush3.msra.mxu1 %v1581_v47  ;;  %2828 = vmatprep.subr.mxu0 %v2920_v34 }
 0x395   :  { %2763 = vmatprep.subr.mxu1 %v1596_v48  ;;  %2830 = vmatprep.mubr.msk.f32.mxu0 %vm2921_vm4, %v2920_v34 }
 0x396   :  { %2764 = vmatpush3.msra.mxu1 %v1580_v49  ;;  %2829 = vmatpush3.msra.mxu0 %v1972_v11 }
 0x397   :  { %2765 = vmatprep.subr.mxu1 %v1595_v50  ;;  %2833 = vmatprep.subr.mxu0 %v2920_v34 }
 0x398   :  { %2766 = vmatpush3.msra.mxu1 %v1579_v51 }
 0x399   :  { %2767 = vmatprep.subr.mxu1 %v1594_v52 }
 0x39a   :  { %2768 = vmatpush3.msra.mxu1 %v1578_v53 }
 0x39b   :  { %2769 = vmatprep.subr.mxu1 %v1593_v54 }
 0x39c   :  { %2770 = vmatpush3.msra.mxu1 %v1577_v55  ;;  %v2131_v55 = vld [vmem:[%s5067_s7] sm:$0x1] }
 0x39d   :  { %2771 = vmatprep.subr.mxu1 %v1592_v56 }
 0x39e   :  { %2772 = vmatpush3.msra.mxu1 %v1576_v58 }
 0x39f   :  { %2773 = vmatprep.subr.mxu1 %v1591_v59  ;;  %v2135_v59 = vld [vmem:[%s5068_s8] sm:$0x1] }
 0x3a0   :  { %2774 = vmatpush3.msra.mxu1 %v1575_v62 }
 0x3a1   :  { %2775 = vmatprep.subr.mxu1 %v1590_v63 }
 0x3a2   :  { %2776 = vmatpush3.msra.mxu1 %v1574_v0  ;;  %v2302_v0 = vld [vmem:[%s5071_s11 + $0x28] sm:$0xff] }
 0x3a3   :  { %1951 = vmatmul.mubr.f32.vlgmr.msra.gmra.mxu1 %v1430_v2  ;;  %2852 = vmatprep.subr.mxu1 %v2920_v34  ;;  %v2301_v2 = vld [vmem:[%s5071_s11 + $0x20] sm:$0xff] }
 0x3a4   :  { %2854 = vmatprep.mubr.msk.f32.mxu1 %vm2921_vm4, %v2920_v34  ;;  %2853 = vmatpush3.msra.mxu1 %v2138_v43 }
 0x3a5   :  { %2857 = vmatprep.subr.mxu1 %v2920_v34 }
 0x421   :  { %v2637_v12 = vpop.f32.mrf.mxu1 }
 0x423   :  { %v2638_v13 = vpop.f32.mrf.mxu1 }
 0x424   :  { %v2672_v14 = vpop.f32.mrf.mxu0  ;;  %v2639_v60 = vadd.f32 %v2638_v13, %v2637_v12 }
 0x426   :  { %v2673_v16 = vpop.f32.mrf.mxu0 }
 0x427   :  { %v2674_v57 = vadd.f32 %v2673_v16, %v2672_v14 }
 0x429   :  { %v1743_v23 = vadd.f32 %v2674_v57, %v2639_v60 }
 0x442   :  { %v2707_v15 = vpop.f32.mrf.mxu1 }
 0x444   :  { %v2708_v19 = vpop.f32.mrf.mxu1 }
 0x445   :  { %v2742_v21 = vpop.f32.mrf.mxu0  ;;  %v2709_v61 = vadd.f32 %v2708_v19, %v2707_v15  ;;  %v2422_v19 = vld [vmem:[%s5074_s14 + $0x8] sm:$0xff] }
 0x447   :  { %v2743_v22 = vpop.f32.mrf.mxu0  ;;  %v1813_v1 = vadd.f32 %v2709_v61, %v1743_v23 }
 0x448   :  { %v2744_v9 = vadd.f32 %v2743_v22, %v2742_v21  ;;  %v2421_v21 = vld [vmem:[%s5074_s14] sm:$0xff] }
 0x44a   :  { %v1883_v26 = vadd.f32 %v2744_v9, %v1813_v1 }
 0x463   :  { %v2777_v24 = vpop.f32.mrf.mxu1 }
 0x465   :  { %v2778_v25 = vpop.f32.mrf.mxu1 }
 0x466   :  { %v2779_v18 = vadd.f32 %v2778_v25, %v2777_v24 }
 0x468   :  { %v4970_v27 = vadd.f32 %v2779_v18, %v1883_v26 }
 0x46a   :  { %v1957_v28 = vsel %vm1956_vm5, %v4970_v27, 0.0  ;;  %v1964_v29 = vmul.f32 %v4970_v27, %v4970_v27 }
 0x46b   :  { %v1958_v30 = vrot.slane %v1957_v28, 4 }
 0x46c   :  { %v1965_v32 = vsel %vm1956_vm5, %v1964_v29, 0.0 }
 0x46d   :  { %v1959_v31 = vadd.f32 %v1958_v30, %v1957_v28  ;;  %v1966_v36 = vrot.slane %v1965_v32, 4 }
 0x46f   :  { %v1960_v33 = vrot.slane %v1959_v31, 2  ;;  %v1967_v37 = vadd.f32 %v1966_v36, %v1965_v32 }
 0x471   :  { %v1961_v35 = vadd.f32 %v1960_v33, %v1959_v31  ;;  %v1968_v39 = vrot.slane %v1967_v37, 2 }
 0x473   :  { %v1962_v20 = vrot.slane %v1961_v35, 1  ;;  %v1969_v40 = vadd.f32 %v1968_v39, %v1967_v37  ;;  %v2399_v37 = vld [vmem:[%s5072_s12] sm:$0x1]  ;;  %s2922_s12 = smov [#allocation2]  }
 0x474   :  { %s2512_s21 = sshll.u32 %s2922_s12, 4  ;;  %s2513_s21 = int_to_ptr.vmem [resolvable:$true] %s2512_s21 }
 0x475   :  { %v1963_v38 = vadd.f32 %v1962_v20, %v1961_v35  ;;  %v1970_v41 = vrot.slane %v1969_v40, 1  ;;  %p2903_p1 = scmp.lt.s32.totalorder %s2513_s21, %s2513_s21 }
 0x477   :  { %2831 = vmatmul.mubr.msk.f32.vlgmr.msra.gmra.mxu0 %vm480_vm0, %v1963_v38  ;;  %v1971_v42 = vadd.f32 %v1970_v41, %v1969_v40  ;;  %v2403_v40 = vld [vmem:[%s5073_s13] sm:$0x1]  ;;  %s2898_s13 = scalar_lea.vmem %s2513_s21, 32 }
 0x478   :  { %2834 = vmatpush3.msra.mxu0 %v1979_v3  ;;  %2849 = vmatprep.mubr.msk.f32.mxu0 %vm2921_vm4, %v2920_v34  ;;  %v2300_v3 = vld [vmem:[%s5071_s11 + $0x18] sm:$0xff]  ;;  %p2899_p0 = scmp.ne.s32.totalorder %s2513_s21, %s2898_s13  ;;  %p2904_p2 = scmp.lt.s32.totalorder %s2898_s13, %s2898_s13 }
 0x479   :  { %2835 = vmatprep.subr.mxu0 %v2920_v34 }
 0x47a   :  { %2836 = vmatpush3.msra.mxu0 %v1978_v4  ;;  %v2299_v4 = vld [vmem:[%s5071_s11 + $0x10] sm:$0xff]  ;;  %p2905_p3 = por %p2904_p2, %p2903_p1 }
 0x47b   :  { %2837 = vmatprep.subr.mxu0 %v2920_v34 }
 0x47c   :  { %2838 = vmatpush3.msra.mxu0 %v1977_v17  ;;  %v2298_v17 = vld [vmem:[%s5071_s11 + $0x8] sm:$0xff]  ;;  %p2906_p4 = pnand %p2905_p3, %p2899_p0 }
 0x47d   :  { %2839 = vmatprep.subr.mxu0 %v2920_v34 }
 0x47e   :  { %2840 = vmatpush3.msra.mxu0 %v1976_v6  ;;  %v2297_v6 = vld [vmem:[%s5071_s11] sm:$0xff] }
 0x47f   :  { %2841 = vmatprep.subr.mxu0 %v2920_v34 }
 0x480   :  { %2842 = vmatpush3.msra.mxu0 %v1975_v7 }
 0x481   :  { %2843 = vmatprep.subr.mxu0 %v2920_v34 }
 0x482   :  { %2844 = vmatpush3.msra.mxu0 %v1974_v8 }
 0x483   :  { %2845 = vmatprep.subr.mxu0 %v2920_v34 }
 0x484   :  { %2846 = vmatpush3.msra.mxu0 %v1973_v10 }
 0x485   :  { %2847 = vmatprep.subr.mxu0 %v2920_v34 }
 0x486   :  { %2848 = vmatpush3.msra.mxu0 %v1972_v11 }
 0x487   :  { %2850 = vmatmul.mubr.msk.f32.vlgmr.msra.gmra.mxu0 %vm480_vm0, %v1971_v42  ;;  %2862 = vmatprep.subr.mxu0 %v2920_v34 }
 0x488   :  { %2878 = vmatprep.mubr.msk.f32.mxu0 %vm2921_vm4, %v2920_v34  ;;  %2863 = vmatpush3.msra.mxu0 %v2304_v44 }
 0x489   :  { %2864 = vmatprep.subr.mxu0 %v2920_v34 }
 0x48a   :  { %2865 = vmatpush3.msra.mxu0 %v2303_v45 }
 0x48b   :  { %2866 = vmatprep.subr.mxu0 %v2920_v34 }
 0x48c   :  { %2867 = vmatpush3.msra.mxu0 %v2302_v0 }
 0x48d   :  { %2868 = vmatprep.subr.mxu0 %v2920_v34 }
 0x48e   :  { %2869 = vmatpush3.msra.mxu0 %v2301_v2 }
 0x48f   :  { %2870 = vmatprep.subr.mxu0 %v2920_v34 }
 0x490   :  { %2871 = vmatpush3.msra.mxu0 %v2300_v3 }
 0x491   :  { %2872 = vmatprep.subr.mxu0 %v2920_v34 }
 0x492   :  { %2873 = vmatpush3.msra.mxu0 %v2299_v4 }
 0x493   :  { %2874 = vmatprep.subr.mxu0 %v2920_v34 }
 0x494   :  { %2875 = vmatpush3.msra.mxu0 %v2298_v17 }
 0x495   :  { %2876 = vmatprep.subr.mxu0 %v2920_v34 }
 0x496   :  { %2877 = vmatpush3.msra.mxu0 %v2297_v6 }
 0x537   :  { %v2049_v46 = vpop.f32.mrf.mxu0 }
 0x538   :  { %v2127_v48 = vmul.f32 0.0625, %v2049_v46 }
 0x539   :  { %v2832_v47 = vpop.f32.mrf.mxu0 }
 0x53a   :  { %v2129_v50 = vmul.f32 %v2127_v48, %v2127_v48 }
 0x547   :  { %v2122_v49 = vpop.f32.mrf.mxu0 }
 0x548   :  { %v2128_v51 = vmul.f32 0.0625, %v2122_v49 }
 0x549   :  { %v2851_v52 = vpop.f32.mrf.mxu0 }
 0x54a   :  { %v2130_v53 = vsub.f32 %v2128_v51, %v2129_v50 }
 0x54c   :  { %v2132_v54 = vadd.f32 1e-05, %v2130_v53 }
 0x54e   :  { %2894 = vrsqrt.f32 %v2132_v54 }
 0x55b   :  { %v2895_v56 = vpop.eup %2894 }
 0x55c   :  { %v2134_v58 = vmul.f32 %v2895_v56, %v2131_v55 }
 0x55e   :  { %2855 = vmatmul.mubr.msk.f32.vlgmr.msra.gmra.mxu1 %vm2139_vm6, %v2134_v58  ;;  %v2136_v62 = vmul.f32 %v2134_v58, %v2127_v48  ;;  %v2533_v48 = vld [vmem:[%s5075_s15] ss:$0 sm:$0xff] }
 0x55f   :  { %2858 = vmatpush3.msra.mxu1 %v2138_v43  ;;  %2859 = vmatprep.mubr.msk.f32.mxu1 %vm2921_vm4, %v2920_v34 }
 0x560   :  { %v2137_v63 = vsub.f32 %v2135_v59, %v2136_v62  ;;  %2881 = vmatprep.subr.mxu1 %v2920_v34 }
 0x562   :  { %2860 = vmatmul.mubr.msk.f32.vlgmr.msra.gmra.mxu1 %vm2139_vm6, %v2137_v63 }
 0x563   :  { %2885 = vmatprep.mubr.msk.f32.mxu1 %vm2921_vm4, %v2920_v34  ;;  %2882 = vmatpush3.msra.mxu1 %v2422_v19 }
 0x564   :  { %2883 = vmatprep.subr.mxu1 %v2920_v34 }
 0x565   :  { %2884 = vmatpush3.msra.mxu1 %v2421_v21 }
 0x61e   :  { %v2209_v7 = vpop.f32.mrf.mxu1 }
 0x61f   :  { %v2289_v8 = vrot.slane %v2209_v7, %v4623_v5 }
 0x620   :  { %v2856_v10 = vpop.f32.mrf.mxu1 }
 0x621   :  { %v2290_v12 = vmul.f32 %v2289_v8, %v4970_v27 }
 0x622   :  { %v2282_v11 = vpop.f32.mrf.mxu1 }
 0x623   :  { %v2294_v13 = vrot.slane %v2282_v11, %v4623_v5 }
 0x624   :  { %v2861_v14 = vpop.f32.mrf.mxu1 }
 0x625   :  { %v2295_v15 = vadd.f32 %v2294_v13, %v2290_v12 }
 0x627   :  { %v2296_v16 = vmax.f32 %v2295_v15, 0.0 }
 0x629   :  { %2879 = vmatmul.mubr.msk.f32.vlgmr.msra.gmra.mxu0 %vm480_vm0, %v2296_v16 }
 0x6e9   :  { %v2374_v57 = vpop.f32.mrf.mxu0 }
 0x6ea   :  { %v2379_v60 = vsel %vm2378_vm7, %v2374_v57, 0.0  ;;  %v2388_v61 = vmul.f32 %v2374_v57, %v2374_v57 }
 0x6eb   :  { %v2380_v22 = vrot.slane %v2379_v60, 4  ;;  %v2880_v23 = vpop.f32.mrf.mxu0 }
 0x6ec   :  { %v2389_v1 = vsel %vm2378_vm7, %v2388_v61, 0.0 }
 0x6ed   :  { %v2381_v9 = vadd.f32 %v2380_v22, %v2379_v60  ;;  %v2390_v24 = vrot.slane %v2389_v1, 4 }
 0x6ef   :  { %v2382_v25 = vrot.slane %v2381_v9, 2  ;;  %v2391_v26 = vadd.f32 %v2390_v24, %v2389_v1 }
 0x6f1   :  { %v2383_v18 = vadd.f32 %v2382_v25, %v2381_v9  ;;  %v2392_v27 = vrot.slane %v2391_v26, 2 }
 0x6f3   :  { %v2384_v28 = vrot.slane %v2383_v18, 1  ;;  %v2393_v34 = vadd.f32 %v2392_v27, %v2391_v26 }
 0x6f5   :  { %v2385_v29 = vadd.f32 %v2384_v28, %v2383_v18  ;;  %v2394_v30 = vrot.slane %v2393_v34, 1 }
 0x6f7   :  { %v2387_v31 = vmul.f32 0.5, %v2385_v29  ;;  %v2395_v32 = vadd.f32 %v2394_v30, %v2393_v34 }
 0x6f9   :  { %v2396_v33 = vmul.f32 0.5, %v2395_v32  ;;  %v2397_v35 = vmul.f32 %v2387_v31, %v2387_v31 }
 0x6fb   :  { %v2398_v36 = vsub.f32 %v2396_v33, %v2397_v35 }
 0x6fd   :  { %v2400_v20 = vadd.f32 1e-05, %v2398_v36 }
 0x6ff   :  { %2896 = vrsqrt.f32 %v2400_v20 }
 0x70c   :  { %v2897_v38 = vpop.eup %2896 }
 0x70d   :  { %v2402_v39 = vmul.f32 %v2897_v38, %v2399_v37 }
 0x70f   :  { %v2404_v41 = vmul.f32 %v2402_v39, %v2387_v31  ;;  %v2410_v42 = vrot.slane %v2402_v39, %v4623_v5 }
 0x711   :  { %v2405_v43 = vsub.f32 %v2403_v40, %v2404_v41  ;;  %v2412_v44 = vmul.f32 %v2410_v42, %v2374_v57 }
 0x713   :  { %v2417_v45 = vrot.slane %v2405_v43, %v4623_v5 }
 0x715   :  { %v2419_v46 = vadd.f32 %v2417_v45, %v2412_v44 }
 0x717   :  { %v2420_v47 = vmax.f32 %v2419_v46, 0.0 }
 0x719   :  { %2886 = vmatmul.mubr.msk.f32.vlgmr.msra.gmra.mxu1 %vm2430_vm8, %v2420_v47 }
 0x7d9   :  { %v2500_v49 = vpop.f32.mrf.mxu1 }
 0x7da   :  { %v2501_v50 = vadd.f32 %v2533_v48, %v2500_v49 }
 0x7db   :  { %v2887_v51 = vpop.f32.mrf.mxu1 }
 0x7dc   :  { %2505 = vst.msk [vmem:[#allocation2] sm:$0x3] %vm2504_vm9, %v2501_v50 }
 0x7dd   :  { %2909 = shalt.err (!%p2906_p4)
}
 0x7de   :  { %2515 = dma.vmem_to_hbm [thread:$0]  %s2513_s21, 32, %s5076_s16, [#allocation3]  }
 0x7df   :  { %2918 = dma.done.wait [#allocation3], 32  }
 0x7e0   :  { %2919 = vsyncadd [#allocation3], 4294967264 }
 0x7e1   :  { %2519 = vsyncpa [#allocation3], 1 }

</bundles_post_ra>
